<compile_context>
chip_gen: v6e
topology: v6e:2x2x1
jax: 0.10.0
libtpu: 0.0.40
codegen_flags: <defaults>
</compile_context>

<pallas_src>
import functools
import math

import jax
import jax.numpy as jnp
from jax.experimental import pallas as pl
from jax.experimental.pallas import tpu as pltpu

# ------------------------- synthetic BERT config -------------------------
VOCAB = 128
HIDDEN = 64
N_LAYERS = 2
N_HEADS = 4
HEAD_DIM = HIDDEN // N_HEADS
INTERMEDIATE = 128
MAX_POS = 64
VIDEO_DIM = 768          # hard-coded in VLBert: nn.Linear(768, hidden_size)
N_CLASSES = 10           # stand-in for len(CATEGORY_ID_LIST)
N_CLASSES_PAD = 128      # lane-dense padded tag head (sliced back outside)
LN_EPS = 1e-12


# ----------------------------- in-kernel helpers --------------------------
def _layernorm(x, g, b, eps):
    """x: (N, D); g, b: (1, D)."""
    mean = jnp.mean(x, axis=-1, keepdims=True)
    var = jnp.mean((x - mean) ** 2, axis=-1, keepdims=True)
    return (x - mean) * jax.lax.rsqrt(var + eps) * g + b


def _gelu_tanh(x):
    # TODO(synk): HF BERT default is exact erf-GELU; tanh approximation used here
    # (erf lowering inside Mosaic is not guaranteed).
    c = 0.7978845608028654  # sqrt(2/pi)
    return 0.5 * x * (1.0 + jnp.tanh(c * (x + 0.044715 * x * x * x)))


# ------------------------------ fused kernel ------------------------------
def _fused_forward_kernel(
    # ---- layer-invariant inputs ----
    text_pre_ref, tlng_ref, tlnb_ref,              # text (word+pos+type), text LN
    vfeat_ref, vfcw_ref, vfcb_ref,                 # video features (bf16), video_fc
    vadd_ref, vlng_ref, vlnb_ref,                  # video pos+type, video LN
    amask_ref, pool_ref,                           # (B*S,B*S) additive mask, (B,B*S) pool
    hdw_ref, hdb_ref, tagw_ref, tagb_ref,          # newfc_hidden, newfc_tag (padded)
    # ---- per-layer weights (leading block dim 1, selected by grid index) ----
    wq_ref, bq_ref, wk_ref, bk_ref, wv_ref, bv_ref,
    wo_ref, bo_ref, ln1g_ref, ln1b_ref,
    wi_ref, bi_ref, wo2_ref, bo2_ref, ln2g_ref, ln2b_ref,
    # ---- output ----
    out_ref,
    # ---- scratch ----
    h_ref,
    *, n_heads, head_dim, eps):
    l = pl.program_id(0)
    n_l = pl.num_programs(0)
    d = n_heads * head_dim

    # --------- layer 0: fused embeddings + sequence assembly into VMEM ---------
    @pl.when(l == 0)
    def _():
        out_ref[...] = jnp.zeros_like(out_ref)
        # text BertEmbeddings: (word + pos + type) precomputed in JAX -> LayerNorm here
        t_ln = _layernorm(text_pre_ref[...], tlng_ref[...], tlnb_ref[...], eps)
        # video_fc (bf16 MXU, f32 accumulate) + video BertEmbeddings add + LayerNorm
        v_lin = jnp.dot(vfeat_ref[...], vfcw_ref[...],
                        preferred_element_type=jnp.float32) + vfcb_ref[...]
        v_ln = _layernorm(v_lin + vadd_ref[...], vlng_ref[...], vlnb_ref[...], eps)
        # Row order: [all text rows | all video rows]. The additive mask and pooling
        # matrix are built in this same order; the tag head is mean-pooled so the
        # permutation vs. the reference [CLS|video|text] concat is semantics-preserving.
        # dropout(0.2) after the concat -> identity in eval/inference mode.
        h_ref[...] = jnp.concatenate([t_ln, v_ln], axis=0)          # (B*S, D)

    # --------- encoder layer l (every grid step), fully VMEM-resident ---------
    h = h_ref[...]                                                   # (B*S, D)
    q = jnp.dot(h, wq_ref[0], preferred_element_type=jnp.float32) + bq_ref[0]
    k = jnp.dot(h, wk_ref[0], preferred_element_type=jnp.float32) + bk_ref[0]
    v = jnp.dot(h, wv_ref[0], preferred_element_type=jnp.float32) + bv_ref[0]
    am = amask_ref[...]                                              # (B*S, B*S)

    lane = jax.lax.broadcasted_iota(jnp.int32, (1, d), 1)
    ctx = jnp.zeros_like(h)
    for hh in range(n_heads):   # static unroll; head selected via lane mask (no slicing)
        msk = jnp.logical_and(lane >= hh * head_dim,
                              lane < (hh + 1) * head_dim).astype(jnp.float32)
        s = jax.lax.dot_general(q, k * msk, (((1,), (1,)), ((), ())),
                                preferred_element_type=jnp.float32)  # (B*S, B*S)
        s = s + am                                  # padding + cross-batch additive mask
        s = s - jnp.max(s, axis=-1, keepdims=True)
        p = jnp.exp(s)
        p = p / jnp.sum(p, axis=-1, keepdims=True)
        # non-head columns of (v * msk) are zero, so accumulation == head concat
        ctx = ctx + jnp.dot(p, v * msk, preferred_element_type=jnp.float32)

    attn = jnp.dot(ctx, wo_ref[0], preferred_element_type=jnp.float32) + bo_ref[0]
    h1 = _layernorm(attn + h, ln1g_ref[0], ln1b_ref[0], eps)
    inter = jnp.dot(h1, wi_ref[0], preferred_element_type=jnp.float32) + bi_ref[0]
    inter = _gelu_tanh(inter)
    ffn = jnp.dot(inter, wo2_ref[0], preferred_element_type=jnp.float32) + bo2_ref[0]
    h2 = _layernorm(ffn + h1, ln2g_ref[0], ln2b_ref[0], eps)
    h_ref[...] = h2

    # --------- last layer: mean-pool (matmul) + newfc_hidden + newfc_tag ---------
    @pl.when(l == n_l - 1)
    def _():
        # torch.mean(features, 1): unmasked mean over all S rows of each batch element,
        # expressed as a (B, B*S) pooling matmul (no slicing).
        fm = jnp.dot(pool_ref[...], h2, preferred_element_type=jnp.float32)   # (B, D)
        emb = jnp.dot(fm, hdw_ref[...], preferred_element_type=jnp.float32) + hdb_ref[...]
        pred = jnp.dot(emb, tagw_ref[...], preferred_element_type=jnp.float32) + tagb_ref[...]
        out_ref[...] = pred.astype(out_ref.dtype)


# --------------------------- model forward ---------------------------------
def multimodal_forward(params, text_input, text_mask, video_feature, video_mask):
    """MultiModal.forward with task={'tag'}, inference=True (eval mode).

    # TODO(synk): MaskLM / ShuffleVideo host-side RNG augmentations and the mlm/itm
    # loss branches have no clean in-kernel equivalent; only the deterministic
    # tag/inference path is implemented.
    """
    B, Lt = text_input.shape
    Lv = video_feature.shape[1]
    S = Lt + Lv                       # == 1 + Lv + (Lt - 1) of the reference concat
    D = HIDDEN

    te = params["text_emb"]
    ve = params["video_emb"]

    # --- cheap JAX glue (gathers / tiny adds / mask construction) ---
    text_pre = (te["word"][text_input]
                + te["pos"][:Lt][None, :, :]
                + te["type"][0][None, None, :]).reshape(B * Lt, D)          # (B*Lt, D)
    v_add = jnp.tile(ve["pos"][:Lv] + ve["type"][0][None, :], (B, 1))       # (B*Lv, D)
    vfeat = video_feature.reshape(B * Lv, VIDEO_DIM).astype(jnp.bfloat16)   # bf16 DMA/MXU

    # Row order [text rows (all batches) | video rows (all batches)].
    flat_mask = jnp.concatenate([text_mask.reshape(-1), video_mask.reshape(-1)])
    batch_id = jnp.concatenate([jnp.repeat(jnp.arange(B), Lt),
                                jnp.repeat(jnp.arange(B), Lv)])
    same_b = batch_id[:, None] == batch_id[None, :]
    # within a batch element: (1 - mask_key) * -10000 (exact reference semantics);
    # cross-batch (an artifact of folding batch into the block): large negative.
    amask = jnp.where(same_b, (1.0 - flat_mask)[None, :] * -10000.0,
                      -1e9).astype(jnp.float32)                             # (B*S, B*S)
    pool = (batch_id[None, :] == jnp.arange(B)[:, None]).astype(jnp.float32) / S  # (B, B*S)

    n_layers = params["wq"].shape[0]
    kernel = functools.partial(_fused_forward_kernel,
                               n_heads=N_HEADS, head_dim=HEAD_DIM, eps=LN_EPS)

    def inv(r, c):                  # layer-invariant 2-D block (fetched once)
        return pl.BlockSpec((r, c), lambda l: (0, 0))

    def per_layer(r, c):            # per-layer 2-D tile selected by the grid index
        return pl.BlockSpec((1, r, c), lambda l: (l, 0, 0))

    in_specs = [
        inv(B * Lt, D), inv(1, D), inv(1, D),                       # text_pre, text LN
        inv(B * Lv, VIDEO_DIM), inv(VIDEO_DIM, D), inv(1, D),       # vfeat, video_fc
        inv(B * Lv, D), inv(1, D), inv(1, D),                       # v_add, video LN
        inv(B * S, B * S), inv(B, B * S),                           # amask, pool
        inv(D, D), inv(1, D), inv(D, N_CLASSES_PAD), inv(1, N_CLASSES_PAD),   # head
        per_layer(D, D), per_layer(1, D),                           # wq, bq
        per_layer(D, D), per_layer(1, D),                           # wk, bk
        per_layer(D, D), per_layer(1, D),                           # wv, bv
        per_layer(D, D), per_layer(1, D),                           # attn out
        per_layer(1, D), per_layer(1, D),                           # LN1
        per_layer(D, INTERMEDIATE), per_layer(1, INTERMEDIATE),     # intermediate
        per_layer(INTERMEDIATE, D), per_layer(1, D),                # output
        per_layer(1, D), per_layer(1, D),                           # LN2
    ]

    pred_pad = pl.pallas_call(
        kernel,
        out_shape=jax.ShapeDtypeStruct((B, N_CLASSES_PAD), jnp.float32),
        grid=(n_layers,),
        in_specs=in_specs,
        out_specs=pl.BlockSpec((B, N_CLASSES_PAD), lambda l: (0, 0)),
        scratch_shapes=[pltpu.VMEM((B * S, D), jnp.float32)],       # resident hidden state
        compiler_params=pltpu.CompilerParams(dimension_semantics=("arbitrary",)),
    )(
        text_pre, te["ln_g"], te["ln_b"],
        vfeat, params["video_fc_w"], params["video_fc_b"],
        v_add, ve["ln_g"], ve["ln_b"],
        amask, pool,
        params["fc_hidden_w"], params["fc_hidden_b"],
        params["fc_tag_w_pad"], params["fc_tag_b_pad"],
        params["wq"], params["bq"], params["wk"], params["bk"],
        params["wv"], params["bv"], params["wo"], params["bo"],
        params["ln1_g"], params["ln1_b"], params["wi"], params["bi"],
        params["wo2"], params["bo2"], params["ln2_g"], params["ln2_b"],
    )

    pred = pred_pad[:, :N_CLASSES]
    return jnp.argmax(pred, axis=1), pred


# --------------------------- parameter init --------------------------------
def init_params(key):
    keys = iter(jax.random.split(key, 128))

    def dense(fan_in, fan_out):
        return 0.02 * jax.random.normal(next(keys), (fan_in, fan_out), jnp.float32)

    def emb_block():
        return {
            "word": 0.02 * jax.random.normal(next(keys), (VOCAB, HIDDEN), jnp.float32),
            "pos": 0.02 * jax.random.normal(next(keys), (MAX_POS, HIDDEN), jnp.float32),
            "type": 0.02 * jax.random.normal(next(keys), (2, HIDDEN), jnp.float32),
            "ln_g": jnp.ones((1, HIDDEN), jnp.float32),
            "ln_b": jnp.zeros((1, HIDDEN), jnp.float32),
        }

    fc_tag_w = dense(HIDDEN, N_CLASSES)
    params = {
        "text_emb": emb_block(),
        "video_emb": emb_block(),
        "video_fc_w": dense(VIDEO_DIM, HIDDEN).astype(jnp.bfloat16),   # bf16 MXU path
        "video_fc_b": jnp.zeros((1, HIDDEN), jnp.float32),
        "fc_hidden_w": dense(HIDDEN, HIDDEN),
        "fc_hidden_b": jnp.zeros((1, HIDDEN), jnp.float32),
        # pad tag head to 128 lanes (zero columns ignored via slice outside)
        "fc_tag_w_pad": jnp.pad(fc_tag_w, ((0, 0), (0, N_CLASSES_PAD - N_CLASSES))),
        "fc_tag_b_pad": jnp.zeros((1, N_CLASSES_PAD), jnp.float32),
    }

    names = ["wq", "bq", "wk", "bk", "wv", "bv", "wo", "bo",
             "ln1_g", "ln1_b", "wi", "bi", "wo2", "bo2", "ln2_g", "ln2_b"]
    stack = {n: [] for n in names}
    scale = 1.0 / math.sqrt(HEAD_DIM)     # folded into Q projection once at init
    for _ in range(N_LAYERS):
        stack["wq"].append(dense(HIDDEN, HIDDEN) * scale)
        stack["bq"].append(jnp.zeros((1, HIDDEN), jnp.float32))      # (already scaled: 0)
        stack["wk"].append(dense(HIDDEN, HIDDEN))
        stack["bk"].append(jnp.zeros((1, HIDDEN), jnp.float32))
        stack["wv"].append(dense(HIDDEN, HIDDEN))
        stack["bv"].append(jnp.zeros((1, HIDDEN), jnp.float32))
        stack["wo"].append(dense(HIDDEN, HIDDEN))
        stack["bo"].append(jnp.zeros((1, HIDDEN), jnp.float32))
        stack["ln1_g"].append(jnp.ones((1, HIDDEN), jnp.float32))
        stack["ln1_b"].append(jnp.zeros((1, HIDDEN), jnp.float32))
        stack["wi"].append(dense(HIDDEN, INTERMEDIATE))
        stack["bi"].append(jnp.zeros((1, INTERMEDIATE), jnp.float32))
        stack["wo2"].append(dense(INTERMEDIATE, HIDDEN))
        stack["bo2"].append(jnp.zeros((1, HIDDEN), jnp.float32))
        stack["ln2_g"].append(jnp.ones((1, HIDDEN), jnp.float32))
        stack["ln2_b"].append(jnp.zeros((1, HIDDEN), jnp.float32))
    for n in names:
        params[n] = jnp.stack(stack[n], axis=0)     # (N_LAYERS, ...)
    return params


# --------------------------------- main -------------------------------------
if __name__ == "__main__":
    key = jax.random.PRNGKey(0)
    pkey, k1, k2 = jax.random.split(key, 3)
    params = init_params(pkey)

    B, Lt, Lv = 2, 8, 8            # concatenated seq len S = Lt + Lv = 16
    text_input = jax.random.randint(k1, (B, Lt), 0, VOCAB, dtype=jnp.int32)
    text_mask = jnp.ones((B, Lt), jnp.float32).at[1, Lt - 1].set(0.0)
    video_feature = jax.random.normal(k2, (B, Lv, VIDEO_DIM), jnp.float32)
    video_mask = jnp.ones((B, Lv), jnp.float32).at[1, Lv - 1].set(0.0)

    pred_label, pred = jax.jit(multimodal_forward)(
        params, text_input, text_mask, video_feature, video_mask
    )
    jax.block_until_ready((pred_label, pred))
    assert pred.shape == (B, N_CLASSES) and pred_label.shape == (B,)
    print("KERNEL_OK")
</pallas_src>

<mosaic_0001>
module attributes {stable_mosaic.version = 11 : i64} {
  func.func @_fused_forward_kernel(%arg0: i32, %arg1: memref<16x64xf32, #tpu.memory_space<vmem>>, %arg2: memref<1x64xf32, #tpu.memory_space<vmem>>, %arg3: memref<1x64xf32, #tpu.memory_space<vmem>>, %arg4: memref<16x768xbf16, #tpu.memory_space<vmem>>, %arg5: memref<768x64xbf16, #tpu.memory_space<vmem>>, %arg6: memref<1x64xf32, #tpu.memory_space<vmem>>, %arg7: memref<16x64xf32, #tpu.memory_space<vmem>>, %arg8: memref<1x64xf32, #tpu.memory_space<vmem>>, %arg9: memref<1x64xf32, #tpu.memory_space<vmem>>, %arg10: memref<32x32xf32, #tpu.memory_space<vmem>>, %arg11: memref<2x32xf32, #tpu.memory_space<vmem>>, %arg12: memref<64x64xf32, #tpu.memory_space<vmem>>, %arg13: memref<1x64xf32, #tpu.memory_space<vmem>>, %arg14: memref<64x128xf32, #tpu.memory_space<vmem>>, %arg15: memref<1x128xf32, #tpu.memory_space<vmem>>, %arg16: memref<1x64x64xf32, #tpu.memory_space<vmem>>, %arg17: memref<1x1x64xf32, #tpu.memory_space<vmem>>, %arg18: memref<1x64x64xf32, #tpu.memory_space<vmem>>, %arg19: memref<1x1x64xf32, #tpu.memory_space<vmem>>, %arg20: memref<1x64x64xf32, #tpu.memory_space<vmem>>, %arg21: memref<1x1x64xf32, #tpu.memory_space<vmem>>, %arg22: memref<1x64x64xf32, #tpu.memory_space<vmem>>, %arg23: memref<1x1x64xf32, #tpu.memory_space<vmem>>, %arg24: memref<1x1x64xf32, #tpu.memory_space<vmem>>, %arg25: memref<1x1x64xf32, #tpu.memory_space<vmem>>, %arg26: memref<1x64x128xf32, #tpu.memory_space<vmem>>, %arg27: memref<1x1x128xf32, #tpu.memory_space<vmem>>, %arg28: memref<1x128x64xf32, #tpu.memory_space<vmem>>, %arg29: memref<1x1x64xf32, #tpu.memory_space<vmem>>, %arg30: memref<1x1x64xf32, #tpu.memory_space<vmem>>, %arg31: memref<1x1x64xf32, #tpu.memory_space<vmem>>, %arg32: memref<2x128xf32, #tpu.memory_space<vmem>>, %arg33: memref<32x64xf32, #tpu.memory_space<vmem>>) attributes {dimension_semantics = [#tpu.dimension_semantics<arbitrary>], iteration_bounds = array<i64: 2>, scalar_prefetch = 0 : i64, scratch_operands = 1 : i64, tpu.core_type = #tpu.core_type<tc>, window_params = [{pipeline_mode = #tpu.pipeline_mode<synchronous>, transform_indices = @transform_0, window_bounds = array<i64: 16, 64>}, {pipeline_mode = #tpu.pipeline_mode<synchronous>, transform_indices = @transform_1, window_bounds = array<i64: 1, 64>}, {pipeline_mode = #tpu.pipeline_mode<synchronous>, transform_indices = @transform_2, window_bounds = array<i64: 1, 64>}, {pipeline_mode = #tpu.pipeline_mode<synchronous>, transform_indices = @transform_3, window_bounds = array<i64: 16, 768>}, {pipeline_mode = #tpu.pipeline_mode<synchronous>, transform_indices = @transform_4, window_bounds = array<i64: 768, 64>}, {pipeline_mode = #tpu.pipeline_mode<synchronous>, transform_indices = @transform_5, window_bounds = array<i64: 1, 64>}, {pipeline_mode = #tpu.pipeline_mode<synchronous>, transform_indices = @transform_6, window_bounds = array<i64: 16, 64>}, {pipeline_mode = #tpu.pipeline_mode<synchronous>, transform_indices = @transform_7, window_bounds = array<i64: 1, 64>}, {pipeline_mode = #tpu.pipeline_mode<synchronous>, transform_indices = @transform_8, window_bounds = array<i64: 1, 64>}, {pipeline_mode = #tpu.pipeline_mode<synchronous>, transform_indices = @transform_9, window_bounds = array<i64: 32, 32>}, {pipeline_mode = #tpu.pipeline_mode<synchronous>, transform_indices = @transform_10, window_bounds = array<i64: 2, 32>}, {pipeline_mode = #tpu.pipeline_mode<synchronous>, transform_indices = @transform_11, window_bounds = array<i64: 64, 64>}, {pipeline_mode = #tpu.pipeline_mode<synchronous>, transform_indices = @transform_12, window_bounds = array<i64: 1, 64>}, {pipeline_mode = #tpu.pipeline_mode<synchronous>, transform_indices = @transform_13, window_bounds = array<i64: 64, 128>}, {pipeline_mode = #tpu.pipeline_mode<synchronous>, transform_indices = @transform_14, window_bounds = array<i64: 1, 128>}, {transform_indices = @transform_15, window_bounds = array<i64: 1, 64, 64>}, {transform_indices = @transform_16, window_bounds = array<i64: 1, 1, 64>}, {transform_indices = @transform_17, window_bounds = array<i64: 1, 64, 64>}, {transform_indices = @transform_18, window_bounds = array<i64: 1, 1, 64>}, {transform_indices = @transform_19, window_bounds = array<i64: 1, 64, 64>}, {transform_indices = @transform_20, window_bounds = array<i64: 1, 1, 64>}, {transform_indices = @transform_21, window_bounds = array<i64: 1, 64, 64>}, {transform_indices = @transform_22, window_bounds = array<i64: 1, 1, 64>}, {transform_indices = @transform_23, window_bounds = array<i64: 1, 1, 64>}, {transform_indices = @transform_24, window_bounds = array<i64: 1, 1, 64>}, {transform_indices = @transform_25, window_bounds = array<i64: 1, 64, 128>}, {transform_indices = @transform_26, window_bounds = array<i64: 1, 1, 128>}, {transform_indices = @transform_27, window_bounds = array<i64: 1, 128, 64>}, {transform_indices = @transform_28, window_bounds = array<i64: 1, 1, 64>}, {transform_indices = @transform_29, window_bounds = array<i64: 1, 1, 64>}, {transform_indices = @transform_30, window_bounds = array<i64: 1, 1, 64>}, {pipeline_mode = #tpu.pipeline_mode<synchronous>, transform_indices = @transform_31, window_bounds = array<i64: 2, 128>}]} {
    %c0_i32 = arith.constant 0 : i32
    %0 = arith.cmpi eq, %arg0, %c0_i32 : i32
    %1 = arith.extui %0 : i1 to i32
    %c0_i32_0 = arith.constant 0 : i32
    %2 = arith.cmpi ne, %1, %c0_i32_0 : i32
    scf.if %2 {
      %cst_95 = arith.constant 0.000000e+00 : f32
      %216 = vector.broadcast %cst_95 : f32 to vector<2x128xf32>
      %c0_96 = arith.constant 0 : index
      %c0_97 = arith.constant 0 : index
      %217 = vector.load %arg32[%c0_96, %c0_97] : memref<2x128xf32, #tpu.memory_space<vmem>>, vector<2x128xf32>
      tpu.vector_store %arg32[%c0_96, %c0_97], %216 {strides = array<i32>} : memref<2x128xf32, #tpu.memory_space<vmem>>, vector<2x128xf32>,
      %c0_98 = arith.constant 0 : index
      %c0_99 = arith.constant 0 : index
      %218 = vector.load %arg1[%c0_98, %c0_99] : memref<16x64xf32, #tpu.memory_space<vmem>>, vector<16x64xf32>
      %c0_100 = arith.constant 0 : index
      %c0_101 = arith.constant 0 : index
      %219 = vector.load %arg2[%c0_100, %c0_101] : memref<1x64xf32, #tpu.memory_space<vmem>>, vector<1x64xf32>
      %c0_102 = arith.constant 0 : index
      %c0_103 = arith.constant 0 : index
      %220 = vector.load %arg3[%c0_102, %c0_103] : memref<1x64xf32, #tpu.memory_space<vmem>>, vector<1x64xf32>
      %cst_104 = arith.constant dense<0.000000e+00> : vector<16xf32>
      %221 = vector.multi_reduction <add>, %218, %cst_104 [1] : vector<16x64xf32> to vector<16xf32>
      %222 = vector.shape_cast %221 : vector<16xf32> to vector<16x1xf32>
      %cst_105 = arith.constant 6.400000e+01 : f32
      %223 = vector.broadcast %cst_105 : f32 to vector<16x1xf32>
      %224 = arith.divf %222, %223 : vector<16x1xf32>
      %225 = vector.broadcast %224 : vector<16x1xf32> to vector<16x64xf32>
      %226 = arith.subf %218, %225 : vector<16x64xf32>
      %227 = arith.mulf %226, %226 : vector<16x64xf32>
      %cst_106 = arith.constant dense<0.000000e+00> : vector<16xf32>
      %228 = vector.multi_reduction <add>, %227, %cst_106 [1] : vector<16x64xf32> to vector<16xf32>
      %229 = vector.shape_cast %228 : vector<16xf32> to vector<16x1xf32>
      %cst_107 = arith.constant 6.400000e+01 : f32
      %230 = vector.broadcast %cst_107 : f32 to vector<16x1xf32>
      %231 = arith.divf %229, %230 : vector<16x1xf32>
      %232 = vector.broadcast %224 : vector<16x1xf32> to vector<16x64xf32>
      %233 = arith.subf %218, %232 : vector<16x64xf32>
      %cst_108 = arith.constant 9.99999996E-13 : f32
      %234 = vector.broadcast %cst_108 : f32 to vector<16x1xf32>
      %235 = arith.addf %231, %234 : vector<16x1xf32>
      %236 = math.rsqrt %235 : vector<16x1xf32>
      %237 = vector.broadcast %236 : vector<16x1xf32> to vector<16x64xf32>
      %238 = arith.mulf %233, %237 : vector<16x64xf32>
      %239 = vector.broadcast %219 : vector<1x64xf32> to vector<16x64xf32>
      %240 = arith.mulf %238, %239 : vector<16x64xf32>
      %241 = vector.broadcast %220 : vector<1x64xf32> to vector<16x64xf32>
      %242 = arith.addf %240, %241 : vector<16x64xf32>
      %c0_109 = arith.constant 0 : index
      %c0_110 = arith.constant 0 : index
      %243 = vector.load %arg4[%c0_109, %c0_110] : memref<16x768xbf16, #tpu.memory_space<vmem>>, vector<16x768xbf16>
      %c0_111 = arith.constant 0 : index
      %c0_112 = arith.constant 0 : index
      %244 = vector.load %arg5[%c0_111, %c0_112] : memref<768x64xbf16, #tpu.memory_space<vmem>>, vector<768x64xbf16>
      %cst_113 = arith.constant dense<0.000000e+00> : vector<16x64xf32>
      %245 = tpu.matmul %243, %244, %cst_113 {dimension_numbers = #tpu.dot_dimension_numbers<[1], [0], [0], [1], [0, 0, 1, 1], [], []>} : vector<16x768xbf16>, vector<768x64xbf16>, vector<16x64xf32> -> vector<16x64xf32>
      %c0_114 = arith.constant 0 : index
      %c0_115 = arith.constant 0 : index
      %246 = vector.load %arg6[%c0_114, %c0_115] : memref<1x64xf32, #tpu.memory_space<vmem>>, vector<1x64xf32>
      %247 = vector.broadcast %246 : vector<1x64xf32> to vector<16x64xf32>
      %248 = arith.addf %245, %247 : vector<16x64xf32>
      %c0_116 = arith.constant 0 : index
      %c0_117 = arith.constant 0 : index
      %249 = vector.load %arg7[%c0_116, %c0_117] : memref<16x64xf32, #tpu.memory_space<vmem>>, vector<16x64xf32>
      %250 = arith.addf %248, %249 : vector<16x64xf32>
      %c0_118 = arith.constant 0 : index
      %c0_119 = arith.constant 0 : index
      %251 = vector.load %arg8[%c0_118, %c0_119] : memref<1x64xf32, #tpu.memory_space<vmem>>, vector<1x64xf32>
      %c0_120 = arith.constant 0 : index
      %c0_121 = arith.constant 0 : index
      %252 = vector.load %arg9[%c0_120, %c0_121] : memref<1x64xf32, #tpu.memory_space<vmem>>, vector<1x64xf32>
      %cst_122 = arith.constant dense<0.000000e+00> : vector<16xf32>
      %253 = vector.multi_reduction <add>, %250, %cst_122 [1] : vector<16x64xf32> to vector<16xf32>
      %254 = vector.shape_cast %253 : vector<16xf32> to vector<16x1xf32>
      %cst_123 = arith.constant 6.400000e+01 : f32
      %255 = vector.broadcast %cst_123 : f32 to vector<16x1xf32>
      %256 = arith.divf %254, %255 : vector<16x1xf32>
      %257 = vector.broadcast %256 : vector<16x1xf32> to vector<16x64xf32>
      %258 = arith.subf %250, %257 : vector<16x64xf32>
      %259 = arith.mulf %258, %258 : vector<16x64xf32>
      %cst_124 = arith.constant dense<0.000000e+00> : vector<16xf32>
      %260 = vector.multi_reduction <add>, %259, %cst_124 [1] : vector<16x64xf32> to vector<16xf32>
      %261 = vector.shape_cast %260 : vector<16xf32> to vector<16x1xf32>
      %cst_125 = arith.constant 6.400000e+01 : f32
      %262 = vector.broadcast %cst_125 : f32 to vector<16x1xf32>
      %263 = arith.divf %261, %262 : vector<16x1xf32>
      %264 = vector.broadcast %256 : vector<16x1xf32> to vector<16x64xf32>
      %265 = arith.subf %250, %264 : vector<16x64xf32>
      %cst_126 = arith.constant 9.99999996E-13 : f32
      %266 = vector.broadcast %cst_126 : f32 to vector<16x1xf32>
      %267 = arith.addf %263, %266 : vector<16x1xf32>
      %268 = math.rsqrt %267 : vector<16x1xf32>
      %269 = vector.broadcast %268 : vector<16x1xf32> to vector<16x64xf32>
      %270 = arith.mulf %265, %269 : vector<16x64xf32>
      %271 = vector.broadcast %251 : vector<1x64xf32> to vector<16x64xf32>
      %272 = arith.mulf %270, %271 : vector<16x64xf32>
      %273 = vector.broadcast %252 : vector<1x64xf32> to vector<16x64xf32>
      %274 = arith.addf %272, %273 : vector<16x64xf32>
      %275 = tpu.concatenate %242, %274 in 0 : vector<16x64xf32>, vector<16x64xf32> -> vector<32x64xf32>
      %c0_127 = arith.constant 0 : index
      %c0_128 = arith.constant 0 : index
      %276 = vector.load %arg33[%c0_127, %c0_128] : memref<32x64xf32, #tpu.memory_space<vmem>>, vector<32x64xf32>
      tpu.vector_store %arg33[%c0_127, %c0_128], %275 {strides = array<i32>} : memref<32x64xf32, #tpu.memory_space<vmem>>, vector<32x64xf32>,
    } else {
    }
    %c0 = arith.constant 0 : index
    %c0_1 = arith.constant 0 : index
    %3 = vector.load %arg33[%c0, %c0_1] : memref<32x64xf32, #tpu.memory_space<vmem>>, vector<32x64xf32>
    %c0_2 = arith.constant 0 : index
    %c0_3 = arith.constant 0 : index
    %c0_4 = arith.constant 0 : index
    %4 = vector.load %arg16[%c0_2, %c0_3, %c0_4] : memref<1x64x64xf32, #tpu.memory_space<vmem>>, vector<1x64x64xf32>
    %5 = vector.shape_cast %4 : vector<1x64x64xf32> to vector<64x64xf32>
    %cst = arith.constant dense<0.000000e+00> : vector<32x64xf32>
    %6 = tpu.matmul %3, %5, %cst {dimension_numbers = #tpu.dot_dimension_numbers<[1], [0], [0], [1], [0, 0, 1, 1], [], []>} : vector<32x64xf32>, vector<64x64xf32>, vector<32x64xf32> -> vector<32x64xf32>
    %c0_5 = arith.constant 0 : index
    %c0_6 = arith.constant 0 : index
    %c0_7 = arith.constant 0 : index
    %7 = vector.load %arg17[%c0_5, %c0_6, %c0_7] : memref<1x1x64xf32, #tpu.memory_space<vmem>>, vector<1x1x64xf32>
    %8 = vector.shape_cast %7 : vector<1x1x64xf32> to vector<1x64xf32>
    %9 = vector.broadcast %8 : vector<1x64xf32> to vector<32x64xf32>
    %10 = arith.addf %6, %9 : vector<32x64xf32>
    %c0_8 = arith.constant 0 : index
    %c0_9 = arith.constant 0 : index
    %c0_10 = arith.constant 0 : index
    %11 = vector.load %arg18[%c0_8, %c0_9, %c0_10] : memref<1x64x64xf32, #tpu.memory_space<vmem>>, vector<1x64x64xf32>
    %12 = vector.shape_cast %11 : vector<1x64x64xf32> to vector<64x64xf32>
    %cst_11 = arith.constant dense<0.000000e+00> : vector<32x64xf32>
    %13 = tpu.matmul %3, %12, %cst_11 {dimension_numbers = #tpu.dot_dimension_numbers<[1], [0], [0], [1], [0, 0, 1, 1], [], []>} : vector<32x64xf32>, vector<64x64xf32>, vector<32x64xf32> -> vector<32x64xf32>
    %c0_12 = arith.constant 0 : index
    %c0_13 = arith.constant 0 : index
    %c0_14 = arith.constant 0 : index
    %14 = vector.load %arg19[%c0_12, %c0_13, %c0_14] : memref<1x1x64xf32, #tpu.memory_space<vmem>>, vector<1x1x64xf32>
    %15 = vector.shape_cast %14 : vector<1x1x64xf32> to vector<1x64xf32>
    %16 = vector.broadcast %15 : vector<1x64xf32> to vector<32x64xf32>
    %17 = arith.addf %13, %16 : vector<32x64xf32>
    %c0_15 = arith.constant 0 : index
    %c0_16 = arith.constant 0 : index
    %c0_17 = arith.constant 0 : index
    %18 = vector.load %arg20[%c0_15, %c0_16, %c0_17] : memref<1x64x64xf32, #tpu.memory_space<vmem>>, vector<1x64x64xf32>
    %19 = vector.shape_cast %18 : vector<1x64x64xf32> to vector<64x64xf32>
    %cst_18 = arith.constant dense<0.000000e+00> : vector<32x64xf32>
    %20 = tpu.matmul %3, %19, %cst_18 {dimension_numbers = #tpu.dot_dimension_numbers<[1], [0], [0], [1], [0, 0, 1, 1], [], []>} : vector<32x64xf32>, vector<64x64xf32>, vector<32x64xf32> -> vector<32x64xf32>
    %c0_19 = arith.constant 0 : index
    %c0_20 = arith.constant 0 : index
    %c0_21 = arith.constant 0 : index
    %21 = vector.load %arg21[%c0_19, %c0_20, %c0_21] : memref<1x1x64xf32, #tpu.memory_space<vmem>>, vector<1x1x64xf32>
    %22 = vector.shape_cast %21 : vector<1x1x64xf32> to vector<1x64xf32>
    %23 = vector.broadcast %22 : vector<1x64xf32> to vector<32x64xf32>
    %24 = arith.addf %20, %23 : vector<32x64xf32>
    %c0_22 = arith.constant 0 : index
    %c0_23 = arith.constant 0 : index
    %25 = vector.load %arg10[%c0_22, %c0_23] : memref<32x32xf32, #tpu.memory_space<vmem>>, vector<32x32xf32>
    %26 = tpu.iota {dimensions = array<i32: 1>} : vector<1x64xi32>
    %cst_24 = arith.constant 0.000000e+00 : f32
    %27 = vector.broadcast %cst_24 : f32 to vector<32x64xf32>
    %c0_i32_25 = arith.constant 0 : i32
    %28 = vector.broadcast %c0_i32_25 : i32 to vector<1x64xi32>
    %29 = arith.cmpi sge, %26, %28 : vector<1x64xi32>
    %c16_i32 = arith.constant 16 : i32
    %30 = vector.broadcast %c16_i32 : i32 to vector<1x64xi32>
    %31 = arith.cmpi slt, %26, %30 : vector<1x64xi32>
    %32 = arith.andi %29, %31 : vector<1x64xi1>
    %33 = arith.extui %32 : vector<1x64xi1> to vector<1x64xi32>
    %34 = arith.sitofp %33 : vector<1x64xi32> to vector<1x64xf32>
    %35 = vector.broadcast %34 : vector<1x64xf32> to vector<32x64xf32>
    %36 = arith.mulf %17, %35 : vector<32x64xf32>
    %cst_26 = arith.constant dense<0.000000e+00> : vector<32x32xf32>
    %37 = tpu.matmul %10, %36, %cst_26 {dimension_numbers = #tpu.dot_dimension_numbers<[1], [1], [0], [0], [0, 0, 1, 0], [], []>} : vector<32x64xf32>, vector<32x64xf32>, vector<32x32xf32> -> vector<32x32xf32>
    %38 = arith.addf %37, %25 : vector<32x32xf32>
    %cst_27 = arith.constant dense<0xFF800000> : vector<32xf32>
    %39 = vector.multi_reduction <maximumf>, %38, %cst_27 [1] : vector<32x32xf32> to vector<32xf32>
    %40 = vector.shape_cast %39 : vector<32xf32> to vector<32x1xf32>
    %41 = vector.broadcast %40 : vector<32x1xf32> to vector<32x32xf32>
    %42 = arith.subf %38, %41 : vector<32x32xf32>
    %43 = math.exp %42 : vector<32x32xf32>
    %cst_28 = arith.constant dense<0.000000e+00> : vector<32xf32>
    %44 = vector.multi_reduction <add>, %43, %cst_28 [1] : vector<32x32xf32> to vector<32xf32>
    %45 = vector.shape_cast %44 : vector<32xf32> to vector<32x1xf32>
    %46 = vector.broadcast %45 : vector<32x1xf32> to vector<32x32xf32>
    %47 = arith.divf %43, %46 : vector<32x32xf32>
    %48 = vector.broadcast %34 : vector<1x64xf32> to vector<32x64xf32>
    %49 = arith.mulf %24, %48 : vector<32x64xf32>
    %cst_29 = arith.constant dense<0.000000e+00> : vector<32x64xf32>
    %50 = tpu.matmul %47, %49, %cst_29 {dimension_numbers = #tpu.dot_dimension_numbers<[1], [0], [0], [1], [0, 0, 1, 1], [], []>} : vector<32x32xf32>, vector<32x64xf32>, vector<32x64xf32> -> vector<32x64xf32>
    %51 = arith.addf %27, %50 : vector<32x64xf32>
    %c16_i32_30 = arith.constant 16 : i32
    %52 = vector.broadcast %c16_i32_30 : i32 to vector<1x64xi32>
    %53 = arith.cmpi sge, %26, %52 : vector<1x64xi32>
    %c32_i32 = arith.constant 32 : i32
    %54 = vector.broadcast %c32_i32 : i32 to vector<1x64xi32>
    %55 = arith.cmpi slt, %26, %54 : vector<1x64xi32>
    %56 = arith.andi %53, %55 : vector<1x64xi1>
    %57 = arith.extui %56 : vector<1x64xi1> to vector<1x64xi32>
    %58 = arith.sitofp %57 : vector<1x64xi32> to vector<1x64xf32>
    %59 = vector.broadcast %58 : vector<1x64xf32> to vector<32x64xf32>
    %60 = arith.mulf %17, %59 : vector<32x64xf32>
    %cst_31 = arith.constant dense<0.000000e+00> : vector<32x32xf32>
    %61 = tpu.matmul %10, %60, %cst_31 {dimension_numbers = #tpu.dot_dimension_numbers<[1], [1], [0], [0], [0, 0, 1, 0], [], []>} : vector<32x64xf32>, vector<32x64xf32>, vector<32x32xf32> -> vector<32x32xf32>
    %62 = arith.addf %61, %25 : vector<32x32xf32>
    %cst_32 = arith.constant dense<0xFF800000> : vector<32xf32>
    %63 = vector.multi_reduction <maximumf>, %62, %cst_32 [1] : vector<32x32xf32> to vector<32xf32>
    %64 = vector.shape_cast %63 : vector<32xf32> to vector<32x1xf32>
    %65 = vector.broadcast %64 : vector<32x1xf32> to vector<32x32xf32>
    %66 = arith.subf %62, %65 : vector<32x32xf32>
    %67 = math.exp %66 : vector<32x32xf32>
    %cst_33 = arith.constant dense<0.000000e+00> : vector<32xf32>
    %68 = vector.multi_reduction <add>, %67, %cst_33 [1] : vector<32x32xf32> to vector<32xf32>
    %69 = vector.shape_cast %68 : vector<32xf32> to vector<32x1xf32>
    %70 = vector.broadcast %69 : vector<32x1xf32> to vector<32x32xf32>
    %71 = arith.divf %67, %70 : vector<32x32xf32>
    %72 = vector.broadcast %58 : vector<1x64xf32> to vector<32x64xf32>
    %73 = arith.mulf %24, %72 : vector<32x64xf32>
    %cst_34 = arith.constant dense<0.000000e+00> : vector<32x64xf32>
    %74 = tpu.matmul %71, %73, %cst_34 {dimension_numbers = #tpu.dot_dimension_numbers<[1], [0], [0], [1], [0, 0, 1, 1], [], []>} : vector<32x32xf32>, vector<32x64xf32>, vector<32x64xf32> -> vector<32x64xf32>
    %75 = arith.addf %51, %74 : vector<32x64xf32>
    %c32_i32_35 = arith.constant 32 : i32
    %76 = vector.broadcast %c32_i32_35 : i32 to vector<1x64xi32>
    %77 = arith.cmpi sge, %26, %76 : vector<1x64xi32>
    %c48_i32 = arith.constant 48 : i32
    %78 = vector.broadcast %c48_i32 : i32 to vector<1x64xi32>
    %79 = arith.cmpi slt, %26, %78 : vector<1x64xi32>
    %80 = arith.andi %77, %79 : vector<1x64xi1>
    %81 = arith.extui %80 : vector<1x64xi1> to vector<1x64xi32>
    %82 = arith.sitofp %81 : vector<1x64xi32> to vector<1x64xf32>
    %83 = vector.broadcast %82 : vector<1x64xf32> to vector<32x64xf32>
    %84 = arith.mulf %17, %83 : vector<32x64xf32>
    %cst_36 = arith.constant dense<0.000000e+00> : vector<32x32xf32>
    %85 = tpu.matmul %10, %84, %cst_36 {dimension_numbers = #tpu.dot_dimension_numbers<[1], [1], [0], [0], [0, 0, 1, 0], [], []>} : vector<32x64xf32>, vector<32x64xf32>, vector<32x32xf32> -> vector<32x32xf32>
    %86 = arith.addf %85, %25 : vector<32x32xf32>
    %cst_37 = arith.constant dense<0xFF800000> : vector<32xf32>
    %87 = vector.multi_reduction <maximumf>, %86, %cst_37 [1] : vector<32x32xf32> to vector<32xf32>
    %88 = vector.shape_cast %87 : vector<32xf32> to vector<32x1xf32>
    %89 = vector.broadcast %88 : vector<32x1xf32> to vector<32x32xf32>
    %90 = arith.subf %86, %89 : vector<32x32xf32>
    %91 = math.exp %90 : vector<32x32xf32>
    %cst_38 = arith.constant dense<0.000000e+00> : vector<32xf32>
    %92 = vector.multi_reduction <add>, %91, %cst_38 [1] : vector<32x32xf32> to vector<32xf32>
    %93 = vector.shape_cast %92 : vector<32xf32> to vector<32x1xf32>
    %94 = vector.broadcast %93 : vector<32x1xf32> to vector<32x32xf32>
    %95 = arith.divf %91, %94 : vector<32x32xf32>
    %96 = vector.broadcast %82 : vector<1x64xf32> to vector<32x64xf32>
    %97 = arith.mulf %24, %96 : vector<32x64xf32>
    %cst_39 = arith.constant dense<0.000000e+00> : vector<32x64xf32>
    %98 = tpu.matmul %95, %97, %cst_39 {dimension_numbers = #tpu.dot_dimension_numbers<[1], [0], [0], [1], [0, 0, 1, 1], [], []>} : vector<32x32xf32>, vector<32x64xf32>, vector<32x64xf32> -> vector<32x64xf32>
    %99 = arith.addf %75, %98 : vector<32x64xf32>
    %c48_i32_40 = arith.constant 48 : i32
    %100 = vector.broadcast %c48_i32_40 : i32 to vector<1x64xi32>
    %101 = arith.cmpi sge, %26, %100 : vector<1x64xi32>
    %c64_i32 = arith.constant 64 : i32
    %102 = vector.broadcast %c64_i32 : i32 to vector<1x64xi32>
    %103 = arith.cmpi slt, %26, %102 : vector<1x64xi32>
    %104 = arith.andi %101, %103 : vector<1x64xi1>
    %105 = arith.extui %104 : vector<1x64xi1> to vector<1x64xi32>
    %106 = arith.sitofp %105 : vector<1x64xi32> to vector<1x64xf32>
    %107 = vector.broadcast %106 : vector<1x64xf32> to vector<32x64xf32>
    %108 = arith.mulf %17, %107 : vector<32x64xf32>
    %cst_41 = arith.constant dense<0.000000e+00> : vector<32x32xf32>
    %109 = tpu.matmul %10, %108, %cst_41 {dimension_numbers = #tpu.dot_dimension_numbers<[1], [1], [0], [0], [0, 0, 1, 0], [], []>} : vector<32x64xf32>, vector<32x64xf32>, vector<32x32xf32> -> vector<32x32xf32>
    %110 = arith.addf %109, %25 : vector<32x32xf32>
    %cst_42 = arith.constant dense<0xFF800000> : vector<32xf32>
    %111 = vector.multi_reduction <maximumf>, %110, %cst_42 [1] : vector<32x32xf32> to vector<32xf32>
    %112 = vector.shape_cast %111 : vector<32xf32> to vector<32x1xf32>
    %113 = vector.broadcast %112 : vector<32x1xf32> to vector<32x32xf32>
    %114 = arith.subf %110, %113 : vector<32x32xf32>
    %115 = math.exp %114 : vector<32x32xf32>
    %cst_43 = arith.constant dense<0.000000e+00> : vector<32xf32>
    %116 = vector.multi_reduction <add>, %115, %cst_43 [1] : vector<32x32xf32> to vector<32xf32>
    %117 = vector.shape_cast %116 : vector<32xf32> to vector<32x1xf32>
    %118 = vector.broadcast %117 : vector<32x1xf32> to vector<32x32xf32>
    %119 = arith.divf %115, %118 : vector<32x32xf32>
    %120 = vector.broadcast %106 : vector<1x64xf32> to vector<32x64xf32>
    %121 = arith.mulf %24, %120 : vector<32x64xf32>
    %cst_44 = arith.constant dense<0.000000e+00> : vector<32x64xf32>
    %122 = tpu.matmul %119, %121, %cst_44 {dimension_numbers = #tpu.dot_dimension_numbers<[1], [0], [0], [1], [0, 0, 1, 1], [], []>} : vector<32x32xf32>, vector<32x64xf32>, vector<32x64xf32> -> vector<32x64xf32>
    %123 = arith.addf %99, %122 : vector<32x64xf32>
    %c0_45 = arith.constant 0 : index
    %c0_46 = arith.constant 0 : index
    %c0_47 = arith.constant 0 : index
    %124 = vector.load %arg22[%c0_45, %c0_46, %c0_47] : memref<1x64x64xf32, #tpu.memory_space<vmem>>, vector<1x64x64xf32>
    %125 = vector.shape_cast %124 : vector<1x64x64xf32> to vector<64x64xf32>
    %cst_48 = arith.constant dense<0.000000e+00> : vector<32x64xf32>
    %126 = tpu.matmul %123, %125, %cst_48 {dimension_numbers = #tpu.dot_dimension_numbers<[1], [0], [0], [1], [0, 0, 1, 1], [], []>} : vector<32x64xf32>, vector<64x64xf32>, vector<32x64xf32> -> vector<32x64xf32>
    %c0_49 = arith.constant 0 : index
    %c0_50 = arith.constant 0 : index
    %c0_51 = arith.constant 0 : index
    %127 = vector.load %arg23[%c0_49, %c0_50, %c0_51] : memref<1x1x64xf32, #tpu.memory_space<vmem>>, vector<1x1x64xf32>
    %128 = vector.shape_cast %127 : vector<1x1x64xf32> to vector<1x64xf32>
    %129 = vector.broadcast %128 : vector<1x64xf32> to vector<32x64xf32>
    %130 = arith.addf %126, %129 : vector<32x64xf32>
    %131 = arith.addf %130, %3 : vector<32x64xf32>
    %c0_52 = arith.constant 0 : index
    %c0_53 = arith.constant 0 : index
    %c0_54 = arith.constant 0 : index
    %132 = vector.load %arg24[%c0_52, %c0_53, %c0_54] : memref<1x1x64xf32, #tpu.memory_space<vmem>>, vector<1x1x64xf32>
    %133 = vector.shape_cast %132 : vector<1x1x64xf32> to vector<1x64xf32>
    %c0_55 = arith.constant 0 : index
    %c0_56 = arith.constant 0 : index
    %c0_57 = arith.constant 0 : index
    %134 = vector.load %arg25[%c0_55, %c0_56, %c0_57] : memref<1x1x64xf32, #tpu.memory_space<vmem>>, vector<1x1x64xf32>
    %135 = vector.shape_cast %134 : vector<1x1x64xf32> to vector<1x64xf32>
    %cst_58 = arith.constant dense<0.000000e+00> : vector<32xf32>
    %136 = vector.multi_reduction <add>, %131, %cst_58 [1] : vector<32x64xf32> to vector<32xf32>
    %137 = vector.shape_cast %136 : vector<32xf32> to vector<32x1xf32>
    %cst_59 = arith.constant 6.400000e+01 : f32
    %138 = vector.broadcast %cst_59 : f32 to vector<32x1xf32>
    %139 = arith.divf %137, %138 : vector<32x1xf32>
    %140 = vector.broadcast %139 : vector<32x1xf32> to vector<32x64xf32>
    %141 = arith.subf %131, %140 : vector<32x64xf32>
    %142 = arith.mulf %141, %141 : vector<32x64xf32>
    %cst_60 = arith.constant dense<0.000000e+00> : vector<32xf32>
    %143 = vector.multi_reduction <add>, %142, %cst_60 [1] : vector<32x64xf32> to vector<32xf32>
    %144 = vector.shape_cast %143 : vector<32xf32> to vector<32x1xf32>
    %cst_61 = arith.constant 6.400000e+01 : f32
    %145 = vector.broadcast %cst_61 : f32 to vector<32x1xf32>
    %146 = arith.divf %144, %145 : vector<32x1xf32>
    %147 = vector.broadcast %139 : vector<32x1xf32> to vector<32x64xf32>
    %148 = arith.subf %131, %147 : vector<32x64xf32>
    %cst_62 = arith.constant 9.99999996E-13 : f32
    %149 = vector.broadcast %cst_62 : f32 to vector<32x1xf32>
    %150 = arith.addf %146, %149 : vector<32x1xf32>
    %151 = math.rsqrt %150 : vector<32x1xf32>
    %152 = vector.broadcast %151 : vector<32x1xf32> to vector<32x64xf32>
    %153 = arith.mulf %148, %152 : vector<32x64xf32>
    %154 = vector.broadcast %133 : vector<1x64xf32> to vector<32x64xf32>
    %155 = arith.mulf %153, %154 : vector<32x64xf32>
    %156 = vector.broadcast %135 : vector<1x64xf32> to vector<32x64xf32>
    %157 = arith.addf %155, %156 : vector<32x64xf32>
    %c0_63 = arith.constant 0 : index
    %c0_64 = arith.constant 0 : index
    %c0_65 = arith.constant 0 : index
    %158 = vector.load %arg26[%c0_63, %c0_64, %c0_65] : memref<1x64x128xf32, #tpu.memory_space<vmem>>, vector<1x64x128xf32>
    %159 = vector.shape_cast %158 : vector<1x64x128xf32> to vector<64x128xf32>
    %cst_66 = arith.constant dense<0.000000e+00> : vector<32x128xf32>
    %160 = tpu.matmul %157, %159, %cst_66 {dimension_numbers = #tpu.dot_dimension_numbers<[1], [0], [0], [1], [0, 0, 1, 1], [], []>} : vector<32x64xf32>, vector<64x128xf32>, vector<32x128xf32> -> vector<32x128xf32>
    %c0_67 = arith.constant 0 : index
    %c0_68 = arith.constant 0 : index
    %c0_69 = arith.constant 0 : index
    %161 = vector.load %arg27[%c0_67, %c0_68, %c0_69] : memref<1x1x128xf32, #tpu.memory_space<vmem>>, vector<1x1x128xf32>
    %162 = vector.shape_cast %161 : vector<1x1x128xf32> to vector<1x128xf32>
    %163 = vector.broadcast %162 : vector<1x128xf32> to vector<32x128xf32>
    %164 = arith.addf %160, %163 : vector<32x128xf32>
    %cst_70 = arith.constant 5.000000e-01 : f32
    %165 = vector.broadcast %cst_70 : f32 to vector<32x128xf32>
    %166 = arith.mulf %165, %164 : vector<32x128xf32>
    %cst_71 = arith.constant 4.471500e-02 : f32
    %167 = vector.broadcast %cst_71 : f32 to vector<32x128xf32>
    %168 = arith.mulf %167, %164 : vector<32x128xf32>
    %169 = arith.mulf %168, %164 : vector<32x128xf32>
    %170 = arith.mulf %169, %164 : vector<32x128xf32>
    %171 = arith.addf %164, %170 : vector<32x128xf32>
    %cst_72 = arith.constant 0.797884583 : f32
    %172 = vector.broadcast %cst_72 : f32 to vector<32x128xf32>
    %173 = arith.mulf %172, %171 : vector<32x128xf32>
    %174 = math.tanh %173 : vector<32x128xf32>
    %cst_73 = arith.constant 1.000000e+00 : f32
    %175 = vector.broadcast %cst_73 : f32 to vector<32x128xf32>
    %176 = arith.addf %175, %174 : vector<32x128xf32>
    %177 = arith.mulf %166, %176 : vector<32x128xf32>
    %c0_74 = arith.constant 0 : index
    %c0_75 = arith.constant 0 : index
    %c0_76 = arith.constant 0 : index
    %178 = vector.load %arg28[%c0_74, %c0_75, %c0_76] : memref<1x128x64xf32, #tpu.memory_space<vmem>>, vector<1x128x64xf32>
    %179 = vector.shape_cast %178 : vector<1x128x64xf32> to vector<128x64xf32>
    %cst_77 = arith.constant dense<0.000000e+00> : vector<32x64xf32>
    %180 = tpu.matmul %177, %179, %cst_77 {dimension_numbers = #tpu.dot_dimension_numbers<[1], [0], [0], [1], [0, 0, 1, 1], [], []>} : vector<32x128xf32>, vector<128x64xf32>, vector<32x64xf32> -> vector<32x64xf32>
    %c0_78 = arith.constant 0 : index
    %c0_79 = arith.constant 0 : index
    %c0_80 = arith.constant 0 : index
    %181 = vector.load %arg29[%c0_78, %c0_79, %c0_80] : memref<1x1x64xf32, #tpu.memory_space<vmem>>, vector<1x1x64xf32>
    %182 = vector.shape_cast %181 : vector<1x1x64xf32> to vector<1x64xf32>
    %183 = vector.broadcast %182 : vector<1x64xf32> to vector<32x64xf32>
    %184 = arith.addf %180, %183 : vector<32x64xf32>
    %185 = arith.addf %184, %157 : vector<32x64xf32>
    %c0_81 = arith.constant 0 : index
    %c0_82 = arith.constant 0 : index
    %c0_83 = arith.constant 0 : index
    %186 = vector.load %arg30[%c0_81, %c0_82, %c0_83] : memref<1x1x64xf32, #tpu.memory_space<vmem>>, vector<1x1x64xf32>
    %187 = vector.shape_cast %186 : vector<1x1x64xf32> to vector<1x64xf32>
    %c0_84 = arith.constant 0 : index
    %c0_85 = arith.constant 0 : index
    %c0_86 = arith.constant 0 : index
    %188 = vector.load %arg31[%c0_84, %c0_85, %c0_86] : memref<1x1x64xf32, #tpu.memory_space<vmem>>, vector<1x1x64xf32>
    %189 = vector.shape_cast %188 : vector<1x1x64xf32> to vector<1x64xf32>
    %cst_87 = arith.constant dense<0.000000e+00> : vector<32xf32>
    %190 = vector.multi_reduction <add>, %185, %cst_87 [1] : vector<32x64xf32> to vector<32xf32>
    %191 = vector.shape_cast %190 : vector<32xf32> to vector<32x1xf32>
    %cst_88 = arith.constant 6.400000e+01 : f32
    %192 = vector.broadcast %cst_88 : f32 to vector<32x1xf32>
    %193 = arith.divf %191, %192 : vector<32x1xf32>
    %194 = vector.broadcast %193 : vector<32x1xf32> to vector<32x64xf32>
    %195 = arith.subf %185, %194 : vector<32x64xf32>
    %196 = arith.mulf %195, %195 : vector<32x64xf32>
    %cst_89 = arith.constant dense<0.000000e+00> : vector<32xf32>
    %197 = vector.multi_reduction <add>, %196, %cst_89 [1] : vector<32x64xf32> to vector<32xf32>
    %198 = vector.shape_cast %197 : vector<32xf32> to vector<32x1xf32>
    %cst_90 = arith.constant 6.400000e+01 : f32
    %199 = vector.broadcast %cst_90 : f32 to vector<32x1xf32>
    %200 = arith.divf %198, %199 : vector<32x1xf32>
    %201 = vector.broadcast %193 : vector<32x1xf32> to vector<32x64xf32>
    %202 = arith.subf %185, %201 : vector<32x64xf32>
    %cst_91 = arith.constant 9.99999996E-13 : f32
    %203 = vector.broadcast %cst_91 : f32 to vector<32x1xf32>
    %204 = arith.addf %200, %203 : vector<32x1xf32>
    %205 = math.rsqrt %204 : vector<32x1xf32>
    %206 = vector.broadcast %205 : vector<32x1xf32> to vector<32x64xf32>
    %207 = arith.mulf %202, %206 : vector<32x64xf32>
    %208 = vector.broadcast %187 : vector<1x64xf32> to vector<32x64xf32>
    %209 = arith.mulf %207, %208 : vector<32x64xf32>
    %210 = vector.broadcast %189 : vector<1x64xf32> to vector<32x64xf32>
    %211 = arith.addf %209, %210 : vector<32x64xf32>
    %c0_92 = arith.constant 0 : index
    %c0_93 = arith.constant 0 : index
    %212 = vector.load %arg33[%c0_92, %c0_93] : memref<32x64xf32, #tpu.memory_space<vmem>>, vector<32x64xf32>
    tpu.vector_store %arg33[%c0_92, %c0_93], %211 {strides = array<i32>} : memref<32x64xf32, #tpu.memory_space<vmem>>, vector<32x64xf32>,
    %c1_i32 = arith.constant 1 : i32
    %213 = arith.cmpi eq, %arg0, %c1_i32 : i32
    %214 = arith.extui %213 : i1 to i32
    %c0_i32_94 = arith.constant 0 : i32
    %215 = arith.cmpi ne, %214, %c0_i32_94 : i32
    scf.if %215 {
      %c0_95 = arith.constant 0 : index
      %c0_96 = arith.constant 0 : index
      %216 = vector.load %arg11[%c0_95, %c0_96] : memref<2x32xf32, #tpu.memory_space<vmem>>, vector<2x32xf32>
      %cst_97 = arith.constant dense<0.000000e+00> : vector<2x64xf32>
      %217 = tpu.matmul %216, %211, %cst_97 {dimension_numbers = #tpu.dot_dimension_numbers<[1], [0], [0], [1], [0, 0, 1, 1], [], []>} : vector<2x32xf32>, vector<32x64xf32>, vector<2x64xf32> -> vector<2x64xf32>
      %c0_98 = arith.constant 0 : index
      %c0_99 = arith.constant 0 : index
      %218 = vector.load %arg12[%c0_98, %c0_99] : memref<64x64xf32, #tpu.memory_space<vmem>>, vector<64x64xf32>
      %cst_100 = arith.constant dense<0.000000e+00> : vector<2x64xf32>
      %219 = tpu.matmul %217, %218, %cst_100 {dimension_numbers = #tpu.dot_dimension_numbers<[1], [0], [0], [1], [0, 0, 1, 1], [], []>} : vector<2x64xf32>, vector<64x64xf32>, vector<2x64xf32> -> vector<2x64xf32>
      %c0_101 = arith.constant 0 : index
      %c0_102 = arith.constant 0 : index
      %220 = vector.load %arg13[%c0_101, %c0_102] : memref<1x64xf32, #tpu.memory_space<vmem>>, vector<1x64xf32>
      %221 = vector.broadcast %220 : vector<1x64xf32> to vector<2x64xf32>
      %222 = arith.addf %219, %221 : vector<2x64xf32>
      %c0_103 = arith.constant 0 : index
      %c0_104 = arith.constant 0 : index
      %223 = vector.load %arg14[%c0_103, %c0_104] : memref<64x128xf32, #tpu.memory_space<vmem>>, vector<64x128xf32>
      %cst_105 = arith.constant dense<0.000000e+00> : vector<2x128xf32>
      %224 = tpu.matmul %222, %223, %cst_105 {dimension_numbers = #tpu.dot_dimension_numbers<[1], [0], [0], [1], [0, 0, 1, 1], [], []>} : vector<2x64xf32>, vector<64x128xf32>, vector<2x128xf32> -> vector<2x128xf32>
      %c0_106 = arith.constant 0 : index
      %c0_107 = arith.constant 0 : index
      %225 = vector.load %arg15[%c0_106, %c0_107] : memref<1x128xf32, #tpu.memory_space<vmem>>, vector<1x128xf32>
      %226 = vector.broadcast %225 : vector<1x128xf32> to vector<2x128xf32>
      %227 = arith.addf %224, %226 : vector<2x128xf32>
      %c0_108 = arith.constant 0 : index
      %c0_109 = arith.constant 0 : index
      %228 = vector.load %arg32[%c0_108, %c0_109] : memref<2x128xf32, #tpu.memory_space<vmem>>, vector<2x128xf32>
      tpu.vector_store %arg32[%c0_108, %c0_109], %227 {strides = array<i32>} : memref<2x128xf32, #tpu.memory_space<vmem>>, vector<2x128xf32>,
    } else {
    }
    return
  }
  func.func @transform_0(%arg0: i32) -> (i32, i32) {
    %c0_i32 = arith.constant 0 : i32
    %c0_i32_0 = arith.constant 0 : i32
    %c0_i32_1 = arith.constant 0 : i32
    return %c0_i32, %c0_i32_0 : i32, i32
  }
  func.func @transform_1(%arg0: i32) -> (i32, i32) {
    %c0_i32 = arith.constant 0 : i32
    %c0_i32_0 = arith.constant 0 : i32
    %c0_i32_1 = arith.constant 0 : i32
    return %c0_i32, %c0_i32_0 : i32, i32
  }
  func.func @transform_2(%arg0: i32) -> (i32, i32) {
    %c0_i32 = arith.constant 0 : i32
    %c0_i32_0 = arith.constant 0 : i32
    %c0_i32_1 = arith.constant 0 : i32
    return %c0_i32, %c0_i32_0 : i32, i32
  }
  func.func @transform_3(%arg0: i32) -> (i32, i32) {
    %c0_i32 = arith.constant 0 : i32
    %c0_i32_0 = arith.constant 0 : i32
    %c0_i32_1 = arith.constant 0 : i32
    return %c0_i32, %c0_i32_0 : i32, i32
  }
  func.func @transform_4(%arg0: i32) -> (i32, i32) {
    %c0_i32 = arith.constant 0 : i32
    %c0_i32_0 = arith.constant 0 : i32
    %c0_i32_1 = arith.constant 0 : i32
    return %c0_i32, %c0_i32_0 : i32, i32
  }
  func.func @transform_5(%arg0: i32) -> (i32, i32) {
    %c0_i32 = arith.constant 0 : i32
    %c0_i32_0 = arith.constant 0 : i32
    %c0_i32_1 = arith.constant 0 : i32
    return %c0_i32, %c0_i32_0 : i32, i32
  }
  func.func @transform_6(%arg0: i32) -> (i32, i32) {
    %c0_i32 = arith.constant 0 : i32
    %c0_i32_0 = arith.constant 0 : i32
    %c0_i32_1 = arith.constant 0 : i32
    return %c0_i32, %c0_i32_0 : i32, i32
  }
  func.func @transform_7(%arg0: i32) -> (i32, i32) {
    %c0_i32 = arith.constant 0 : i32
    %c0_i32_0 = arith.constant 0 : i32
    %c0_i32_1 = arith.constant 0 : i32
    return %c0_i32, %c0_i32_0 : i32, i32
  }
  func.func @transform_8(%arg0: i32) -> (i32, i32) {
    %c0_i32 = arith.constant 0 : i32
    %c0_i32_0 = arith.constant 0 : i32
    %c0_i32_1 = arith.constant 0 : i32
    return %c0_i32, %c0_i32_0 : i32, i32
  }
  func.func @transform_9(%arg0: i32) -> (i32, i32) {
    %c0_i32 = arith.constant 0 : i32
    %c0_i32_0 = arith.constant 0 : i32
    %c0_i32_1 = arith.constant 0 : i32
    return %c0_i32, %c0_i32_0 : i32, i32
  }
  func.func @transform_10(%arg0: i32) -> (i32, i32) {
    %c0_i32 = arith.constant 0 : i32
    %c0_i32_0 = arith.constant 0 : i32
    %c0_i32_1 = arith.constant 0 : i32
    return %c0_i32, %c0_i32_0 : i32, i32
  }
  func.func @transform_11(%arg0: i32) -> (i32, i32) {
    %c0_i32 = arith.constant 0 : i32
    %c0_i32_0 = arith.constant 0 : i32
    %c0_i32_1 = arith.constant 0 : i32
    return %c0_i32, %c0_i32_0 : i32, i32
  }
  func.func @transform_12(%arg0: i32) -> (i32, i32) {
    %c0_i32 = arith.constant 0 : i32
    %c0_i32_0 = arith.constant 0 : i32
    %c0_i32_1 = arith.constant 0 : i32
    return %c0_i32, %c0_i32_0 : i32, i32
  }
  func.func @transform_13(%arg0: i32) -> (i32, i32) {
    %c0_i32 = arith.constant 0 : i32
    %c0_i32_0 = arith.constant 0 : i32
    %c0_i32_1 = arith.constant 0 : i32
    return %c0_i32, %c0_i32_0 : i32, i32
  }
  func.func @transform_14(%arg0: i32) -> (i32, i32) {
    %c0_i32 = arith.constant 0 : i32
    %c0_i32_0 = arith.constant 0 : i32
    %c0_i32_1 = arith.constant 0 : i32
    return %c0_i32, %c0_i32_0 : i32, i32
  }
  func.func @transform_15(%arg0: i32) -> (i32, i32, i32) {
    %c0_i32 = arith.constant 0 : i32
    %c0_i32_0 = arith.constant 0 : i32
    %c0_i32_1 = arith.constant 0 : i32
    return %arg0, %c0_i32, %c0_i32_0 : i32, i32, i32
  }
  func.func @transform_16(%arg0: i32) -> (i32, i32, i32) {
    %c0_i32 = arith.constant 0 : i32
    %c0_i32_0 = arith.constant 0 : i32
    %c0_i32_1 = arith.constant 0 : i32
    return %arg0, %c0_i32, %c0_i32_0 : i32, i32, i32
  }
  func.func @transform_17(%arg0: i32) -> (i32, i32, i32) {
    %c0_i32 = arith.constant 0 : i32
    %c0_i32_0 = arith.constant 0 : i32
    %c0_i32_1 = arith.constant 0 : i32
    return %arg0, %c0_i32, %c0_i32_0 : i32, i32, i32
  }
  func.func @transform_18(%arg0: i32) -> (i32, i32, i32) {
    %c0_i32 = arith.constant 0 : i32
    %c0_i32_0 = arith.constant 0 : i32
    %c0_i32_1 = arith.constant 0 : i32
    return %arg0, %c0_i32, %c0_i32_0 : i32, i32, i32
  }
  func.func @transform_19(%arg0: i32) -> (i32, i32, i32) {
    %c0_i32 = arith.constant 0 : i32
    %c0_i32_0 = arith.constant 0 : i32
    %c0_i32_1 = arith.constant 0 : i32
    return %arg0, %c0_i32, %c0_i32_0 : i32, i32, i32
  }
  func.func @transform_20(%arg0: i32) -> (i32, i32, i32) {
    %c0_i32 = arith.constant 0 : i32
    %c0_i32_0 = arith.constant 0 : i32
    %c0_i32_1 = arith.constant 0 : i32
    return %arg0, %c0_i32, %c0_i32_0 : i32, i32, i32
  }
  func.func @transform_21(%arg0: i32) -> (i32, i32, i32) {
    %c0_i32 = arith.constant 0 : i32
    %c0_i32_0 = arith.constant 0 : i32
    %c0_i32_1 = arith.constant 0 : i32
    return %arg0, %c0_i32, %c0_i32_0 : i32, i32, i32
  }
  func.func @transform_22(%arg0: i32) -> (i32, i32, i32) {
    %c0_i32 = arith.constant 0 : i32
    %c0_i32_0 = arith.constant 0 : i32
    %c0_i32_1 = arith.constant 0 : i32
    return %arg0, %c0_i32, %c0_i32_0 : i32, i32, i32
  }
  func.func @transform_23(%arg0: i32) -> (i32, i32, i32) {
    %c0_i32 = arith.constant 0 : i32
    %c0_i32_0 = arith.constant 0 : i32
    %c0_i32_1 = arith.constant 0 : i32
    return %arg0, %c0_i32, %c0_i32_0 : i32, i32, i32
  }
  func.func @transform_24(%arg0: i32) -> (i32, i32, i32) {
    %c0_i32 = arith.constant 0 : i32
    %c0_i32_0 = arith.constant 0 : i32
    %c0_i32_1 = arith.constant 0 : i32
    return %arg0, %c0_i32, %c0_i32_0 : i32, i32, i32
  }
  func.func @transform_25(%arg0: i32) -> (i32, i32, i32) {
    %c0_i32 = arith.constant 0 : i32
    %c0_i32_0 = arith.constant 0 : i32
    %c0_i32_1 = arith.constant 0 : i32
    return %arg0, %c0_i32, %c0_i32_0 : i32, i32, i32
  }
  func.func @transform_26(%arg0: i32) -> (i32, i32, i32) {
    %c0_i32 = arith.constant 0 : i32
    %c0_i32_0 = arith.constant 0 : i32
    %c0_i32_1 = arith.constant 0 : i32
    return %arg0, %c0_i32, %c0_i32_0 : i32, i32, i32
  }
  func.func @transform_27(%arg0: i32) -> (i32, i32, i32) {
    %c0_i32 = arith.constant 0 : i32
    %c0_i32_0 = arith.constant 0 : i32
    %c0_i32_1 = arith.constant 0 : i32
    return %arg0, %c0_i32, %c0_i32_0 : i32, i32, i32
  }
  func.func @transform_28(%arg0: i32) -> (i32, i32, i32) {
    %c0_i32 = arith.constant 0 : i32
    %c0_i32_0 = arith.constant 0 : i32
    %c0_i32_1 = arith.constant 0 : i32
    return %arg0, %c0_i32, %c0_i32_0 : i32, i32, i32
  }
  func.func @transform_29(%arg0: i32) -> (i32, i32, i32) {
    %c0_i32 = arith.constant 0 : i32
    %c0_i32_0 = arith.constant 0 : i32
    %c0_i32_1 = arith.constant 0 : i32
    return %arg0, %c0_i32, %c0_i32_0 : i32, i32, i32
  }
  func.func @transform_30(%arg0: i32) -> (i32, i32, i32) {
    %c0_i32 = arith.constant 0 : i32
    %c0_i32_0 = arith.constant 0 : i32
    %c0_i32_1 = arith.constant 0 : i32
    return %arg0, %c0_i32, %c0_i32_0 : i32, i32, i32
  }
  func.func @transform_31(%arg0: i32) -> (i32, i32) {
    %c0_i32 = arith.constant 0 : i32
    %c0_i32_0 = arith.constant 0 : i32
    %c0_i32_1 = arith.constant 0 : i32
    return %c0_i32, %c0_i32_0 : i32, i32
  }
}

</mosaic_0001>

<bundles_post_ra>
// kernel: multimodal_forward.1
= control target key start
LH: loop header
LB: loop body
LE: loop exit
PB: predicated region body
PF: predicated region fallthrough
CT: control target
= control target key end

     0   :  { %s5103_s6 = smov 1   ;;  %s5104_s10 = smov 2   ;;  %s5924_s0 = inlined_call_operand.smem [shape: u32[32], index: -1, kind: input, shape index: {}] }
   0x1   :  { %s5146_s5 = sld [smem:[%s5924_s0]]   ;;  %s5105_s14 = smov 3  }
   0x2   :  { %s5151_s9 = sld [smem:[%s5924_s0 + %s5103_s6]]   ;;  %s5106_s18 = smov 4  }
   0x3   :  { %s5156_s13 = sld [smem:[%s5924_s0 + %s5104_s10]]   ;;  %s5107_s22 = smov 5  }
   0x4   :  { %s5161_s17 = sld [smem:[%s5924_s0 + %s5105_s14]]   ;;  %s5108_s26 = smov 6  }
   0x5   :  { %s5166_s21 = sld [smem:[%s5924_s0 + %s5106_s18]]   ;;  %s5109_s30 = smov 7  }
   0x6   :  { %s5171_s25 = sld [smem:[%s5924_s0 + %s5107_s22]]   ;;  %s5110_s4 = smov 8  }
   0x7   :  { %5935 = sst [smem:[#allocation3_spill]] %s5146_s5  ;;  %s5111_s10 = smov 9  }
   0x8   :  { %5936 = sst [smem:[#allocation4_spill]] %s5151_s9  ;;  %s5112_s15 = smov 10  }
   0x9   :  { %5937 = sst [smem:[#allocation5_spill]] %s5156_s13  ;;  %s5113_s20 = smov 11  }
   0xa   :  { %5938 = sst [smem:[#allocation6_spill]] %s5161_s17  ;;  %s5115_s1 = smov 13  }
   0xb   :  { %5939 = sst [smem:[#allocation7_spill]] %s5166_s21  ;;  %s5116_s7 = smov 14  }
   0xc   :  { %5940 = sst [smem:[#allocation8_spill]] %s5171_s25  ;;  %s5118_s22 = smov 16  }
   0xd   :  { %s5176_s29 = sld [smem:[%s5924_s0 + %s5108_s26]]   ;;  %s5114_s26 = smov 12  }
   0xe   :  { %s5181_s3 = sld [smem:[%s5924_s0 + %s5109_s30]]   ;;  %s5119_s28 = smov 17  }
   0xf   :  { %s5186_s8 = sld [smem:[%s5924_s0 + %s5110_s4]]  }
  0x10   :  { %s5191_s14 = sld [smem:[%s5924_s0 + %s5111_s10]]  }
  0x11   :  { %s5196_s19 = sld [smem:[%s5924_s0 + %s5112_s15]]   ;;  %s5117_s15 = smov 15  }
  0x12   :  { %s5201_s24 = sld [smem:[%s5924_s0 + %s5113_s20]]  }
  0x13   :  { %5941 = sst [smem:[#allocation9_spill]] %s5176_s29 }
  0x14   :  { %5942 = sst [smem:[#allocation10_spill]] %s5181_s3 }
  0x15   :  { %5943 = sst [smem:[#allocation11_spill]] %s5186_s8 }
  0x16   :  { %5944 = sst [smem:[#allocation12_spill]] %s5191_s14 }
  0x17   :  { %5945 = sst [smem:[#allocation13_spill]] %s5196_s19 }
  0x18   :  { %5946 = sst [smem:[#allocation14_spill]] %s5201_s24 }
  0x19   :  { %s5206_s30 = sld [smem:[%s5924_s0 + %s5114_s26]]  }
  0x1a   :  { %s5211_s6 = sld [smem:[%s5924_s0 + %s5115_s1]]  }
  0x1b   :  { %s5216_s12 = sld [smem:[%s5924_s0 + %s5116_s7]]   ;;  %s5120_s7 = smov 18  }
  0x1c   :  { %s5221_s20 = sld [smem:[%s5924_s0 + %s5117_s15]]   ;;  %s5121_s15 = smov 19  }
  0x1d   :  { %s5226_s27 = sld [smem:[%s5924_s0 + %s5118_s22]]   ;;  %s5122_s22 = smov 20  }
  0x1e   :  { %s5231_s4 = sld [smem:[%s5924_s0 + %s5119_s28]]   ;;  %s5123_s28 = smov 21  }
  0x1f   :  { %5947 = sst [smem:[#allocation15_spill]] %s5206_s30 }
  0x20   :  { %5948 = sst [smem:[#allocation16_spill]] %s5211_s6 }
  0x21   :  { %5949 = sst [smem:[#allocation17_spill]] %s5216_s12 }
  0x22   :  { %5950 = sst [smem:[#allocation18_spill]] %s5221_s20 }
  0x23   :  { %5951 = sst [smem:[#allocation19_spill]] %s5226_s27 }
  0x24   :  { %5952 = sst [smem:[#allocation20_spill]] %s5231_s4 }
  0x25   :  { %s5236_s12 = sld [smem:[%s5924_s0 + %s5120_s7]]   ;;  %s5124_s7 = smov 22  }
  0x26   :  { %s5241_s30 = sld [smem:[%s5924_s0 + %s5121_s15]]   ;;  %s5125_s15 = smov 23  }
  0x27   :  { %s5246_s6 = sld [smem:[%s5924_s0 + %s5122_s22]]   ;;  %s5126_s22 = smov 24  }
  0x28   :  { %s5251_s19 = sld [smem:[%s5924_s0 + %s5123_s28]]   ;;  %s5127_s28 = smov 25  }
  0x29   :  { %s5256_s24 = sld [smem:[%s5924_s0 + %s5124_s7]]   ;;  %s5128_s7 = smov 26  }
  0x2a   :  { %s5261_s14 = sld [smem:[%s5924_s0 + %s5125_s15]]   ;;  %s5129_s15 = smov 27  }
  0x2b   :  { %s5266_s8 = sld [smem:[%s5924_s0 + %s5126_s22]]   ;;  %s5130_s22 = smov 28  }
  0x2c   :  { %5953 = sst [smem:[#allocation21_spill]] %s5241_s30 }
  0x2d   :  { %s5271_s3 = sld [smem:[%s5924_s0 + %s5127_s28]]   ;;  %s5131_s28 = smov 29  }
  0x2e   :  { %s5276_s13 = sld [smem:[%s5924_s0 + %s5128_s7]]   ;;  %s5132_s7 = smov 30  }
  0x2f   :  { %s5281_s9 = sld [smem:[%s5924_s0 + %s5129_s15]]   ;;  %s5133_s15 = smov 31  }
  0x30   :  { %s5286_s29 = sld [smem:[%s5924_s0 + %s5130_s22]]   ;;  %s5303_s22 = smov 0  }
  0x31   :  { %s5291_s25 = sld [smem:[%s5924_s0 + %s5131_s28]]  }
  0x32   :  { %s5296_s5 = sld [smem:[%s5924_s0 + %s5132_s7]]  }
  0x33   :  { %s5301_s17 = sld [smem:[%s5924_s0 + %s5133_s15]]  }
  0x39   :  { %5954 = sst [smem:[#allocation22_spill]] %s5301_s17 }
  0x3a LB: > { %5955 = sst [smem:[#allocation23_spill]] %s5101_s22  ;;  %s5309_s23 = sadd.s32 4294967295, %s5101_s22   ;;  %s5101_s22 = sphi %s5303_s22, %s73_s22  }
  0x3b   : > { %5956 = sst [smem:[#allocation24_spill]] %s5309_s23  ;;  %p4184_p0 = scmp.ge.s32.totalorder %s5101_s22, 1 }
  0x3c   : > { %p994_p1 = scmp.lt.s32.totalorder %s5101_s22, 3 }
  0x3e   : > { %p995_p2 = pnand %p4184_p0, %p994_p1 }
  0x40   : > { %998 = sbr.rel (%p995_p2) target bundleno = 4022 (0xfb6), region = 144 }
  0x45   : > { %s5958_s20 = sld [smem:[#allocation18_spill]]  ;;  %p1124_p3 = scmp.lt.s32.totalorder %s5309_s23, 1 }
  0x46   : > { %s5959_s4 = sld [smem:[#allocation20_spill]] }
  0x47   : > { %s5960_s30 = sld [smem:[#allocation21_spill]] }
  0x48   : > { %s5315_s0 = scalar_select %p1124_p3, %s5309_s23, 1 }
  0x4a   : > { %s4347_s26 = sshll.u32 %s5315_s0, 6  ;;  %s1147_s11 = scalar_lea.vmem %s5246_s6, %s5315_s0 }
  0x4b   : > { %s5321_s1 = scalar_lea.vmem %s5958_s20, %s4347_s26  ;;  %s5334_s15 = scalar_lea.vmem %s5251_s19, %s4347_s26 }
  0x4c   : > { %5961 = sst [smem:[#allocation25_spill]] %s5321_s1  ;;  %s5324_s2 = scalar_lea.vmem %s5959_s4, %s4347_s26 }
  0x4d   : > { %s5329_s10 = scalar_lea.vmem %s5960_s30, %s4347_s26  ;;  %s1155_s16 = scalar_lea.vmem %s5256_s24, %s5315_s0 }
  0x4e   : > { %s1158_s18 = scalar_lea.vmem %s5261_s14, %s5315_s0  ;;  %s1161_s22 = scalar_lea.vmem %s5266_s8, %s5315_s0 }
  0x4f   : > { %s5343_s17 = scalar_lea.vmem %s5271_s3, %s4347_s26  ;;  %s1169_s21 = scalar_lea.vmem %s5276_s13, %s5315_s0 }
  0x50   : > { %s4352_s23 = sshll.u32 %s5315_s0, 7  ;;  %s1177_s27 = scalar_lea.vmem %s5286_s29, %s5315_s0 }
  0x51   : > { %s5349_s28 = scalar_lea.vmem %s5281_s9, %s4352_s23  ;;  %s5962_s4 = sld [smem:[#allocation24_spill]] }
  0x57   : > { %p4197_p4 = scmp.ne.s32.totalorder %s5962_s4, 0 }
  0x58   : > { %s5963_s7 = sld [smem:[#allocation7_spill]] (!%p4197_p4) }
  0x59   : > { %1188 = sbr.rel (%p4197_p4) target bundleno = 673 (0x2a1), region = 148  ;;  %s5964_s30 = sld [smem:[#allocation22_spill]] (!%p4197_p4) }
  0x5a   : > { %s5966_s4 = sld [smem:[#allocation3_spill]] (!%p4197_p4) }
  0x5b   : > { %s5967_s23 = sld [smem:[#allocation8_spill]] (!%p4197_p4) }
  0x5c   : > { %s5968_s26 = sld [smem:[#allocation9_spill]] (!%p4197_p4) }
  0x5d   : > { %s5970_s1 = sld [smem:[#allocation5_spill]] (!%p4197_p4) }
  0x5e   : > { %v4938_v0 = vld [vmem:[%s5963_s7 + $0x78] sm:$0xff]   ;;  %v5134_v1 = vmov 0.0   ;;  %v4942_v5 = vld [vmem:[%s5963_s7 + $0x70] sm:$0xff]   ;;  %v4946_v9 = vld [vmem:[%s5963_s7 + $0x68] sm:$0xff]   ;;  %vm1194_vm0 = vcmask 523264  }
  0x5f   : > { %1189 = vst [vmem:[%s5964_s30] sm:$0x3] %v5134_v1  ;;  %v4939_v2 = vld [vmem:[%s5963_s7 + $0x38] sm:$0xff]   ;;  %4353 = vmatprep.subr.bf16.mxu0 %v4938_v0  ;;  %v4943_v6 = vld [vmem:[%s5963_s7 + $0x30] sm:$0xff]   ;;  %v4947_v10 = vld [vmem:[%s5963_s7 + $0x28] sm:$0xff]   ;;  %s5965_s30 = sld [smem:[#allocation6_spill]] }
  0x60   : > { %v4940_v3 = vld [vmem:[%s5963_s7 + $0xf8] sm:$0xff]   ;;  %4354 = vmatpush3.bf16.msra.mxu0 %v4939_v2  ;;  %v4944_v7 = vld [vmem:[%s5963_s7 + $0xf0] sm:$0xff]   ;;  %v4948_v11 = vld [vmem:[%s5963_s7 + $0xe8] sm:$0xff]  }
  0x61   : > { %v4941_v4 = vld [vmem:[%s5963_s7 + $0xb8] sm:$0xff]   ;;  %4375 = vmatprep.subr.bf16.mxu1 %v4940_v3  ;;  %4355 = vmatprep.subr.bf16.mxu0 %v4942_v5  ;;  %v4945_v8 = vld [vmem:[%s5963_s7 + $0xb0] sm:$0xff]   ;;  %v4949_v12 = vld [vmem:[%s5963_s7 + $0xa8] sm:$0xff]  }
  0x62   : > { %4376 = vmatpush3.bf16.msra.mxu1 %v4941_v4  ;;  %v4950_v13 = vld [vmem:[%s5963_s7 + $0x60] sm:$0xff]   ;;  %v4954_v17 = vld [vmem:[%s5963_s7 + $0x58] sm:$0xff]   ;;  %v4958_v21 = vld [vmem:[%s5963_s7 + $0x50] sm:$0xff]  }
  0x63   : > { %4377 = vmatprep.subr.bf16.mxu1 %v4944_v7  ;;  %v4951_v14 = vld [vmem:[%s5963_s7 + $0x20] sm:$0xff]   ;;  %v4955_v18 = vld [vmem:[%s5963_s7 + $0x18] sm:$0xff]   ;;  %v4959_v22 = vld [vmem:[%s5963_s7 + $0x10] sm:$0xff]  }
  0x64   : > { %4356 = vmatpush3.bf16.msra.mxu0 %v4943_v6  ;;  %v4952_v15 = vld [vmem:[%s5963_s7 + $0xe0] sm:$0xff]   ;;  %v4956_v19 = vld [vmem:[%s5963_s7 + $0xd8] sm:$0xff]   ;;  %v4960_v23 = vld [vmem:[%s5963_s7 + $0xd0] sm:$0xff]  }
  0x65   : > { %4357 = vmatprep.subr.bf16.mxu0 %v4946_v9  ;;  %v4953_v16 = vld [vmem:[%s5963_s7 + $0xa0] sm:$0xff]   ;;  %v4957_v20 = vld [vmem:[%s5963_s7 + $0x98] sm:$0xff]   ;;  %v4961_v24 = vld [vmem:[%s5963_s7 + $0x90] sm:$0xff]  }
  0x66   : > { %4378 = vmatpush3.bf16.msra.mxu1 %v4945_v8  ;;  %v4962_v25 = vld [vmem:[%s5963_s7 + $0x48] sm:$0xff]   ;;  %v4966_v29 = vld [vmem:[%s5963_s7 + $0x40] sm:$0xff]   ;;  %v4973_v35 = vld [vmem:[%s5963_s7 + $0x178] sm:$0xff]  }
  0x67   : > { %4379 = vmatprep.subr.bf16.mxu1 %v4948_v11  ;;  %v4963_v26 = vld [vmem:[%s5963_s7 + $0x8] sm:$0xff]   ;;  %v4967_v30 = vld [vmem:[%s5963_s7] sm:$0xff]   ;;  %v4977_v38 = vld [vmem:[%s5963_s7 + $0x138] sm:$0xff]  }
  0x68   : > { %4358 = vmatpush3.bf16.msra.mxu0 %v4947_v10  ;;  %v4964_v27 = vld [vmem:[%s5963_s7 + $0xc8] sm:$0xff]   ;;  %v4968_v31 = vld [vmem:[%s5963_s7 + $0xc0] sm:$0xff]   ;;  %v4978_v39 = vld [vmem:[%s5963_s7 + $0x170] sm:$0xff]  }
  0x69   : > { %4359 = vmatprep.subr.bf16.mxu0 %v4950_v13  ;;  %v4965_v28 = vld [vmem:[%s5963_s7 + $0x88] sm:$0xff]   ;;  %v4969_v32 = vld [vmem:[%s5965_s30] ss:$24 sps:$4 sm:$0xff]   ;;  %v4971_v33 = vld [vmem:[%s5965_s30 + $0x4] ss:$24 sps:$4 sm:$0xff]  }
  0x6a   : > { %4380 = vmatpush3.bf16.msra.mxu1 %v4949_v12  ;;  %v4972_v34 = vld [vmem:[%s5963_s7 + $0x80] sm:$0xff]   ;;  %1697 = vmatprep.mubr.bf16.mxu0 %v4971_v33  ;;  %v4979_v40 = vld [vmem:[%s5963_s7 + $0x130] sm:$0xff]   ;;  %v4980_v41 = vld [vmem:[%s5963_s7 + $0x168] sm:$0xff]  }
  0x6b   : > { %4381 = vmatprep.subr.bf16.mxu1 %v4952_v15  ;;  %v4974_v36 = vld [vmem:[%s5965_s30 + $0x8] ss:$24 sps:$4 sm:$0xff]   ;;  %v4976_v37 = vld [vmem:[%s5965_s30 + $0xc] ss:$24 sps:$4 sm:$0xff]   ;;  %v4984_v45 = vld [vmem:[%s5963_s7 + $0x158] sm:$0xff]  }
  0x6c   : > { %4360 = vmatpush3.bf16.msra.mxu0 %v4951_v14  ;;  %1738 = vmatprep.mubr.bf16.mxu1 %v4976_v37  ;;  %v4981_v42 = vld [vmem:[%s5963_s7 + $0x128] sm:$0xff]   ;;  %v4982_v43 = vld [vmem:[%s5963_s7 + $0x160] sm:$0xff]   ;;  %v4985_v46 = vld [vmem:[%s5963_s7 + $0x118] sm:$0xff]  }
  0x6d   : > { %4361 = vmatprep.subr.bf16.mxu0 %v4954_v17  ;;  %v4983_v44 = vld [vmem:[%s5963_s7 + $0x120] sm:$0xff]   ;;  %v4986_v47 = vld [vmem:[%s5963_s7 + $0x150] sm:$0xff]   ;;  %v1191_v50 = vld [vmem:[%s5966_s4 + $0x8] sm:$0xff] }
  0x6e   : > { %4382 = vmatpush3.bf16.msra.mxu1 %v4953_v16  ;;  %v4994_v48 = vld [vmem:[%s5965_s30 + $0x14] ss:$24 sps:$4 sm:$0xff]   ;;  %v1190_v49 = vld [vmem:[%s5966_s4] sm:$0xff]  ;;  %v1198_v54 = vsel %vm1194_vm0, %v1191_v50, 0.0  ;;  %v4992_v58 = vld [vmem:[%s5965_s30 + $0x10] ss:$24 sps:$4 sm:$0xff]  }
  0x6f   : > { %4383 = vmatprep.subr.bf16.mxu1 %v4956_v19  ;;  %v1195_v51 = vsel %vm1194_vm0, %v1190_v49, 0.0  ;;  %v4987_v52 = vld [vmem:[%s5963_s7 + $0x110] sm:$0xff]   ;;  %v4988_v53 = vld [vmem:[%s5963_s7 + $0x148] sm:$0xff]   ;;  %v4990_v56 = vld [vmem:[%s5963_s7 + $0x140] sm:$0xff]  }
  0x70   : > { %4362 = vmatpush3.bf16.msra.mxu0 %v4955_v18  ;;  %1196 = vadd.xlane.f32.xlu0 %v1195_v51  ;;  %v4989_v55 = vld [vmem:[%s5963_s7 + $0x108] sm:$0xff]   ;;  %v4991_v57 = vld [vmem:[%s5963_s7 + $0x100] sm:$0xff]  }
  0x71   : > { %4363 = vmatprep.subr.bf16.mxu0 %v4958_v21  ;;  %v4200_v6 = vld [vmem:[%s5967_s23] ss:$0 sm:$0xff]  ;;  %s5969_s23 = sld [smem:[#allocation4_spill]] }
  0x72   : > { %4384 = vmatpush3.bf16.msra.mxu1 %v4957_v20 }
  0x73   : > { %4385 = vmatprep.subr.bf16.mxu1 %v4960_v23 }
  0x74   : > { %4364 = vmatpush3.bf16.msra.mxu0 %v4959_v22  ;;  %1199 = vadd.xlane.f32.xlu0 %v1198_v54  ;;  %v1788_v22 = vld [vmem:[%s5968_s26] sm:$0xff] }
  0x75   : > { %4365 = vmatprep.subr.bf16.mxu0 %v4962_v25 }
  0x76   : > { %4386 = vmatpush3.bf16.msra.mxu1 %v4961_v24 }
  0x77   : > { %4387 = vmatprep.subr.bf16.mxu1 %v4964_v27 }
  0x78   : > { %4366 = vmatpush3.bf16.msra.mxu0 %v4963_v26 }
  0x79   : > { %4367 = vmatprep.subr.bf16.mxu0 %v4966_v29  ;;  %v1789_v29 = vld [vmem:[%s5968_s26 + $0x8] sm:$0xff] }
  0x7a   : > { %4388 = vmatpush3.bf16.msra.mxu1 %v4965_v28 }
  0x7b   : > { %4389 = vmatprep.subr.bf16.mxu1 %v4968_v31 }
  0x7c   : > { %4368 = vmatpush3.bf16.msra.mxu0 %v4967_v30 }
  0x7d   : > { %4397 = vmatprep.subr.bf16.mxu0 %v4973_v35 }
  0x7e   : > { %4390 = vmatpush3.bf16.msra.mxu1 %v4972_v34 }
  0x7f   : > { %1698 = vmatmul.mubr.bf16.vlgmr.msra.gmra.mxu0 %v4969_v32 }
  0x80   : > { %4398 = vmatpush3.bf16.msra.mxu0 %v4977_v38  ;;  %1779 = vmatprep.mubr.bf16.mxu0 %v4994_v48 }
  0x81   : > { %1739 = vmatmul.mubr.bf16.vlgmr.msra.gmra.mxu1 %v4974_v36  ;;  %4399 = vmatprep.subr.bf16.mxu0 %v4978_v39 }
  0x84   : > { %4400 = vmatpush3.bf16.msra.mxu0 %v4979_v40  ;;  %v4198_v40 = vld [vmem:[%s5969_s23] ss:$0 sm:$0xff]  ;;  %s5972_s23 = sld [smem:[#allocation11_spill]] }
  0x85   : > { %4401 = vmatprep.subr.bf16.mxu0 %v4980_v41 }
  0x88   : > { %4402 = vmatpush3.bf16.msra.mxu0 %v4981_v42  ;;  %v4199_v42 = vld [vmem:[%s5970_s1] ss:$0 sm:$0xff]  ;;  %s5971_s1 = sld [smem:[#allocation10_spill]] }
  0x89   : > { %4403 = vmatprep.subr.bf16.mxu0 %v4982_v43 }
  0x8c   : > { %4404 = vmatpush3.bf16.msra.mxu0 %v4983_v44 }
  0x8d   : > { %4405 = vmatprep.subr.bf16.mxu0 %v4984_v45 }
  0x90   : > { %4406 = vmatpush3.bf16.msra.mxu0 %v4985_v46 }
  0x91   : > { %4407 = vmatprep.subr.bf16.mxu0 %v4986_v47 }
  0x94   : > { %4408 = vmatpush3.bf16.msra.mxu0 %v4987_v52 }
  0x95   : > { %4409 = vmatprep.subr.bf16.mxu0 %v4988_v53 }
  0x98   : > { %4410 = vmatpush3.bf16.msra.mxu0 %v4989_v55 }
  0x99   : > { %4411 = vmatprep.subr.bf16.mxu0 %v4990_v56 }
  0x9c   : > { %4412 = vmatpush3.bf16.msra.mxu0 %v4991_v57 }
  0x9f   : > { %1780 = vmatmul.mubr.bf16.vlgmr.msra.gmra.mxu0 %v4992_v58 }
  0xf9   : > { %v1197_v59 = vpop.xlane.xlu0 %1196 }
  0xfa   : > { %v1202_v60 = vmul.f32 0.015625, %v1197_v59 }
  0xfc   : > { %v1204_v61 = vsub.f32 %v1190_v49, %v1202_v60 }
  0xfd   : > { %v1200_v12 = vpop.xlane.xlu0 %1199 }
  0xfe   : > { %v1206_v62 = vmul.f32 %v1204_v61, %v1204_v61  ;;  %v1203_v16 = vmul.f32 0.015625, %v1200_v12 }
 0x100   : > { %v1208_v63 = vsel %vm1194_vm0, %v1206_v62, 0.0  ;;  %v1205_v28 = vsub.f32 %v1191_v50, %v1203_v16 }
 0x101   : > { %1209 = vadd.xlane.f32.xlu0 %v1208_v63 }
 0x102   : > { %v1207_v33 = vmul.f32 %v1205_v28, %v1205_v28 }
 0x104   : > { %v1211_v35 = vsel %vm1194_vm0, %v1207_v33, 0.0 }
 0x13f   : > { %v4369_v0 = vpop.f32.mrf.mxu0 }
 0x141   : > { %v4370_v1 = vpop.f32.mrf.mxu0  ;;  %v4391_v2 = vpop.f32.mrf.mxu1 }
 0x142   : > { %v4371_v5 = vadd.f32 %v4370_v1, %v4369_v0 }
 0x143   : > { %v4372_v3 = vpop.f32.mrf.mxu0  ;;  %v4392_v4 = vpop.f32.mrf.mxu1 }
 0x144   : > { %v1700_v9 = vadd.f32 %v4371_v5, %v4200_v6  ;;  %v4393_v10 = vadd.f32 %v4392_v4, %v4391_v2  ;;  %v4255_v5 = vld [vmem:[%s5971_s1] ss:$0 sm:$0xff] }
 0x145   : > { %v4373_v7 = vpop.f32.mrf.mxu0  ;;  %v4394_v8 = vpop.f32.mrf.mxu1 }
 0x146   : > { %v4374_v11 = vadd.f32 %v4373_v7, %v4372_v3  ;;  %v1741_v17 = vadd.f32 %v4393_v10, %v1700_v9  ;;  %v4256_v7 = vld [vmem:[%s5972_s23] ss:$0 sm:$0xff] }
 0x147   : > { %v4395_v13 = vpop.f32.mrf.mxu1 }
 0x148   : > { %v1703_v18 = vadd.f32 %v4374_v11, %v4200_v6  ;;  %v4396_v19 = vadd.f32 %v4395_v13, %v4394_v8 }
 0x14a   : > { %v1744_v25 = vadd.f32 %v4396_v19, %v1703_v18 }
 0x15f   : > { %v4413_v14 = vpop.f32.mrf.mxu0 }
 0x161   : > { %v4414_v15 = vpop.f32.mrf.mxu0 }
 0x162   : > { %v4415_v20 = vadd.f32 %v4414_v15, %v4413_v14 }
 0x163   : > { %v4416_v21 = vpop.f32.mrf.mxu0 }
 0x164   : > { %v1782_v23 = vadd.f32 %v4415_v20, %v1741_v17 }
 0x165   : > { %v4417_v24 = vpop.f32.mrf.mxu0 }
 0x166   : > { %v4418_v26 = vadd.f32 %v4417_v24, %v4416_v21  ;;  %v1790_v27 = vadd.f32 %v1788_v22, %v1782_v23 }
 0x168   : > { %v1785_v30 = vadd.f32 %v4418_v26, %v1744_v25  ;;  %v1794_v31 = vsel %vm1194_vm0, %v1790_v27, 0.0 }
 0x169   : > { %1795 = vadd.xlane.f32.xlu1 %v1794_v31 }
 0x16a   : > { %v1791_v32 = vadd.f32 %v1789_v29, %v1785_v30 }
 0x16c   : > { %v1797_v34 = vsel %vm1194_vm0, %v1791_v32, 0.0 }
 0x16d   : > { %1798 = vadd.xlane.f32.xlu1 %v1797_v34 }
 0x171   : > { %1212 = vadd.xlane.f32.xlu1 %v1211_v35 }
 0x18a   : > { %v1210_v36 = vpop.xlane.xlu0 %1209 }
 0x18b   : > { %v1214_v37 = vmul.f32 0.015625, %v1210_v36 }
 0x18d   : > { %v1216_v38 = vadd.f32 1e-12, %v1214_v37 }
 0x18f   : > { %4995 = vrsqrt.f32 %v1216_v38 }
 0x19c   : > { %v4996_v39 = vpop.eup %4995 }
 0x19d   : > { %v1220_v41 = vmul.f32 %v4996_v39, %v1204_v61 }
 0x19f   : > { %v1228_v43 = vmul.f32 %v4198_v40, %v1220_v41 }
 0x1a1   : > { %v1236_v44 = vadd.f32 %v4199_v42, %v1228_v43 }
 0x1a3   : > { %1836 = vst.msk [vmem:[#allocation2] sm:$0xff] %vm1194_vm0, %v1236_v44 }
 0x1f2   : > { %v1796_v45 = vpop.xlane.xlu1 %1795 }
 0x1f3   : > { %v1800_v46 = vmul.f32 0.015625, %v1796_v45 }
 0x1f5   : > { %v1802_v47 = vsub.f32 %v1790_v27, %v1800_v46 }
 0x1f6   : > { %v1799_v48 = vpop.xlane.xlu1 %1798 }
 0x1f7   : > { %v1801_v49 = vmul.f32 0.015625, %v1799_v48  ;;  %v1804_v50 = vmul.f32 %v1802_v47, %v1802_v47 }
 0x1f9   : > { %v1803_v51 = vsub.f32 %v1791_v32, %v1801_v49  ;;  %v1806_v52 = vsel %vm1194_vm0, %v1804_v50, 0.0 }
 0x1fa   : > { %1807 = vadd.xlane.f32.xlu0 %v1806_v52  ;;  %v1213_v53 = vpop.xlane.xlu1 %1212 }
 0x1fb   : > { %v1215_v54 = vmul.f32 0.015625, %v1213_v53  ;;  %v1805_v55 = vmul.f32 %v1803_v51, %v1803_v51 }
 0x1fd   : > { %v1217_v56 = vadd.f32 1e-12, %v1215_v54  ;;  %v1809_v57 = vsel %vm1194_vm0, %v1805_v55, 0.0 }
 0x1fe   : > { %1810 = vadd.xlane.f32.xlu1 %v1809_v57 }
 0x1ff   : > { %4997 = vrsqrt.f32 %v1217_v56 }
 0x20c   : > { %v4998_v58 = vpop.eup %4997 }
 0x20d   : > { %v1221_v59 = vmul.f32 %v4998_v58, %v1205_v28 }
 0x20f   : > { %v1229_v60 = vmul.f32 %v4198_v40, %v1221_v59 }
 0x211   : > { %v1237_v61 = vadd.f32 %v4199_v42, %v1229_v60 }
 0x213   : > { %1837 = vst.msk [vmem:[#allocation2 + $0x8] sm:$0xff] %vm1194_vm0, %v1237_v61 }
 0x283   : > { %v1808_v62 = vpop.xlane.xlu0 %1807 }
 0x284   : > { %v1812_v63 = vmul.f32 0.015625, %v1808_v62 }
 0x286   : > { %v1814_v0 = vadd.f32 1e-12, %v1812_v63 }
 0x287   : > { %v1811_v1 = vpop.xlane.xlu1 %1810 }
 0x288   : > { %4999 = vrsqrt.f32 %v1814_v0  ;;  %v1813_v2 = vmul.f32 0.015625, %v1811_v1 }
 0x28a   : > { %v1815_v3 = vadd.f32 1e-12, %v1813_v2 }
 0x28c   : > { %5001 = vrsqrt.f32 %v1815_v3 }
 0x295   : > { %v5000_v4 = vpop.eup %4999 }
 0x296   : > { %v1818_v6 = vmul.f32 %v5000_v4, %v1802_v47 }
 0x298   : > { %v1826_v8 = vmul.f32 %v4255_v5, %v1818_v6 }
 0x299   : > { %v5002_v9 = vpop.eup %5001 }
 0x29a   : > { %v1834_v10 = vadd.f32 %v4256_v7, %v1826_v8  ;;  %v1819_v11 = vmul.f32 %v5002_v9, %v1803_v51 }
 0x29c   : > { %1838 = vst.msk [vmem:[#allocation2 + $0x10] sm:$0xff] %vm1194_vm0, %v1834_v10  ;;  %v1827_v12 = vmul.f32 %v4255_v5, %v1819_v11 }
 0x29e   : > { %v1835_v13 = vadd.f32 %v4256_v7, %v1827_v12 }
 0x2a0   : > { %1839 = vst.msk [vmem:[#allocation2 + $0x18] sm:$0xff] %vm1194_vm0, %v1835_v13 }
 0x2a1 PF: > { %s5973_s20 = sld [smem:[#allocation25_spill]]  ;;  %vm1859_vm1 = vcmask 523264   ;;  %v1840_v17 = vld [vmem:[#allocation2] sm:$0xff]  ;;  %v2064_v20 = vld [vmem:[%s5329_s10 + $0x38] sm:$0xff]  ;;  %v2063_v21 = vld [vmem:[%s5329_s10 + $0x30] sm:$0xff]  ;;  %v2161_v46 = vlaneseq  ;;  %v5135_v53 = vmov 0.0  }
 0x2a2   : > { %4602 = vmatprep.mubr.msk.f32.mxu1 %vm1859_vm1, %v1840_v17  ;;  %4646 = vmatprep.mubr.msk.f32.mxu0 %vm1859_vm1, %v1840_v17  ;;  %v2062_v23 = vld [vmem:[%s5329_s10 + $0x28] sm:$0xff]  ;;  %v2061_v25 = vld [vmem:[%s5329_s10 + $0x20] sm:$0xff]  ;;  %v2060_v27 = vld [vmem:[%s5329_s10 + $0x18] sm:$0xff]  ;;  %vm2281_vm12 = vcmask 261120  }
 0x2a3   : > { %4630 = vmatprep.subr.mxu0 %v2064_v20  ;;  %v1841_v28 = vld [vmem:[#allocation2 + $0x8] sm:$0xff]  ;;  %v1964_v29 = vld [vmem:[%s5324_s2 + $0x38] sm:$0xff]  ;;  %v1842_v30 = vld [vmem:[#allocation2 + $0x10] sm:$0xff]  ;;  %v2162_v47 = vand.u32 127, %v2161_v46 }
 0x2a4   : > { %4631 = vmatpush3.msra.mxu0 %v2064_v20  ;;  %v1963_v31 = vld [vmem:[%s5324_s2 + $0x30] sm:$0xff]  ;;  %v1962_v33 = vld [vmem:[%s5324_s2 + $0x28] sm:$0xff]  ;;  %v1961_v35 = vld [vmem:[%s5324_s2 + $0x20] sm:$0xff] }
 0x2a5   : > { %4632 = vmatprep.subr.mxu0 %v2063_v21  ;;  %v2059_v32 = vld [vmem:[%s5329_s10 + $0x10] sm:$0xff]  ;;  %v2058_v36 = vld [vmem:[%s5329_s10 + $0x8] sm:$0xff]  ;;  %v1960_v37 = vld [vmem:[%s5324_s2 + $0x18] sm:$0xff]  ;;  %vm2933_vm2 = vcmp.ge.s32.totalorder %v2162_v47, 48  ;;  %vm2934_vm3 = vcmp.lt.s32.totalorder %v2162_v47, 64  ;;  %vm2330_vm5 = vcmp.ge.s32.totalorder %v2162_v47, 16 }
 0x2a6   : > { %4633 = vmatpush3.msra.mxu0 %v2063_v21  ;;  %v2057_v38 = vld [vmem:[%s5329_s10] sm:$0xff]  ;;  %v1959_v39 = vld [vmem:[%s5324_s2 + $0x10] sm:$0xff]  ;;  %v1958_v40 = vld [vmem:[%s5324_s2 + $0x8] sm:$0xff]  ;;  %vm2331_vm6 = vcmp.lt.s32.totalorder %v2162_v47, 32  ;;  %vm2164_vm7 = vcmp.lt.s32.totalorder %v2162_v47, 16  ;;  %vm2678_vm9 = vcmp.ge.s32.totalorder %v2162_v47, 32 }
 0x2a7   : > { %v1851_v14 = vld [vmem:[%s5973_s20 + $0x38] sm:$0xff]  ;;  %v1850_v15 = vld [vmem:[%s5973_s20 + $0x30] sm:$0xff]  ;;  %v1849_v16 = vld [vmem:[%s5973_s20 + $0x28] sm:$0xff]  ;;  %4634 = vmatprep.subr.mxu0 %v2062_v23  ;;  %v5501_v62 = vsel %vm2164_vm7, 1.0, %v5135_v53  ;;  %vm2679_vm10 = vcmp.lt.s32.totalorder %v2162_v47, 48 }
 0x2a8   : > { %4586 = vmatprep.subr.mxu1 %v1851_v14  ;;  %v1848_v18 = vld [vmem:[%s5973_s20 + $0x20] sm:$0xff]  ;;  %v1847_v19 = vld [vmem:[%s5973_s20 + $0x18] sm:$0xff]  ;;  %v1846_v22 = vld [vmem:[%s5973_s20 + $0x10] sm:$0xff]  ;;  %4635 = vmatpush3.msra.mxu0 %v2062_v23 }
 0x2a9   : > { %4587 = vmatpush3.msra.mxu1 %v1851_v14  ;;  %v1845_v24 = vld [vmem:[%s5973_s20 + $0x8] sm:$0xff]  ;;  %v1844_v26 = vld [vmem:[%s5973_s20] sm:$0xff]  ;;  %4636 = vmatprep.subr.mxu0 %v2061_v25  ;;  %v1843_v34 = vld [vmem:[#allocation2 + $0x18] sm:$0xff]  ;;  %s5974_s20 = sld [smem:[#allocation19_spill]] }
 0x2aa   : > { %4588 = vmatprep.subr.mxu1 %v1850_v15  ;;  %4637 = vmatpush3.msra.mxu0 %v2061_v25  ;;  %v1957_v41 = vld [vmem:[%s5324_s2] sm:$0xff]  ;;  %s5976_s2 = scalar_lea.vmem %s5236_s12, %s5315_s0  ;;  %vm2935_vm4 = vmand %vm2933_vm2, %vm2934_vm3 }
 0x2ab   : > { %4589 = vmatpush3.msra.mxu1 %v1850_v15  ;;  %4638 = vmatprep.subr.mxu0 %v2060_v27  ;;  %v4262_v50 = vld [vmem:[%s5976_s2] ss:$0 sm:$0xff]  ;;  %v5493_v54 = vsel %vm2935_vm4, 1.0, %v5135_v53  ;;  %vm2332_vm8 = vmand %vm2330_vm5, %vm2331_vm6 }
 0x2ac   : > { %4590 = vmatprep.subr.mxu1 %v1849_v16  ;;  %4639 = vmatpush3.msra.mxu0 %v2060_v27  ;;  %v4281_v63 = vsel %vm2332_vm8, 1.0, %v5135_v53  ;;  %v4267_v9 = vld [vmem:[%s1147_s11] ss:$0 sm:$0xff]  ;;  %vm2680_vm11 = vmand %vm2678_vm9, %vm2679_vm10  ;;  %s5977_s11 = sld [smem:[#allocation12_spill]] }
 0x2ad   : > { %4591 = vmatpush3.msra.mxu1 %v1849_v16  ;;  %4640 = vmatprep.subr.mxu0 %v2059_v32 }
 0x2ae   : > { %4592 = vmatprep.subr.mxu1 %v1848_v18  ;;  %4641 = vmatpush3.msra.mxu0 %v2059_v32 }
 0x2af   : > { %4593 = vmatpush3.msra.mxu1 %v1848_v18  ;;  %4642 = vmatprep.subr.mxu0 %v2058_v36  ;;  %s5975_s10 = scalar_lea.vmem %s5974_s20, %s5315_s0  ;;  %v5541_v18 = vsel %vm2680_vm11, 1.0, %v5135_v53 }
 0x2b0   : > { %4594 = vmatprep.subr.mxu1 %v1847_v19  ;;  %4643 = vmatpush3.msra.mxu0 %v2058_v36  ;;  %v5475_v43 = vld [vmem:[%s5975_s10] ss:$0 sm:$0xff] }
 0x2b1   : > { %4595 = vmatpush3.msra.mxu1 %v1847_v19  ;;  %4644 = vmatprep.subr.mxu0 %v2057_v38 }
 0x2b2   : > { %4596 = vmatprep.subr.mxu1 %v1846_v22  ;;  %4645 = vmatpush3.msra.mxu0 %v2057_v38  ;;  %v5621_v46 = vld [vmem:[%s5977_s11 + $0x10] sm:$0xff] }
 0x2b3   : > { %4597 = vmatpush3.msra.mxu1 %v1846_v22  ;;  %4647 = vmatmul.mubr.msk.f32.vlgmr.msra.gmra.mxu0 %vm1859_vm1, %v1841_v28 }
 0x2b4   : > { %4598 = vmatprep.subr.mxu1 %v1845_v24  ;;  %4649 = vmatprep.mubr.msk.f32.mxu0 %vm1859_vm1, %v1842_v30 }
 0x2b5   : > { %4599 = vmatpush3.msra.mxu1 %v1845_v24 }
 0x2b6   : > { %4600 = vmatprep.subr.mxu1 %v1844_v26 }
 0x2b7   : > { %4601 = vmatpush3.msra.mxu1 %v1844_v26  ;;  %4650 = vmatmul.mubr.msk.f32.gmra.mxu0 %vm1859_vm1, %v1843_v34 }
 0x2b8   : > { %4603 = vmatmul.mubr.msk.f32.vlgmr.msra.gmra.mxu1 %vm1859_vm1, %v1841_v28  ;;  %4608 = vmatprep.subr.mxu1 %v1964_v29 }
 0x2b9   : > { %4609 = vmatpush3.msra.mxu1 %v1964_v29  ;;  %4605 = vmatprep.mubr.msk.f32.mxu1 %vm1859_vm1, %v1842_v30 }
 0x2ba   : > { %4610 = vmatprep.subr.mxu1 %v1963_v31 }
 0x2bb   : > { %4611 = vmatpush3.msra.mxu1 %v1963_v31 }
 0x2bc   : > { %4612 = vmatprep.subr.mxu1 %v1962_v33  ;;  %4606 = vmatmul.mubr.msk.f32.gmra.mxu1 %vm1859_vm1, %v1843_v34 }
 0x2bd   : > { %4613 = vmatpush3.msra.mxu1 %v1962_v33  ;;  %4624 = vmatprep.mubr.msk.f32.mxu1 %vm1859_vm1, %v1840_v17 }
 0x2be   : > { %4614 = vmatprep.subr.mxu1 %v1961_v35 }
 0x2bf   : > { %4615 = vmatpush3.msra.mxu1 %v1961_v35 }
 0x2c0   : > { %4616 = vmatprep.subr.mxu1 %v1960_v37 }
 0x2c1   : > { %4617 = vmatpush3.msra.mxu1 %v1960_v37 }
 0x2c2   : > { %4618 = vmatprep.subr.mxu1 %v1959_v39 }
 0x2c3   : > { %4619 = vmatpush3.msra.mxu1 %v1959_v39  ;;  %v5614_v39 = vld [vmem:[%s5977_s11] sm:$0xff] }
 0x2c4   : > { %4620 = vmatprep.subr.mxu1 %v1958_v40 }
 0x2c5   : > { %4621 = vmatpush3.msra.mxu1 %v1958_v40  ;;  %v5617_v40 = vld [vmem:[%s5977_s11 + $0x8] sm:$0xff] }
 0x2c6   : > { %4622 = vmatprep.subr.mxu1 %v1957_v41 }
 0x2c7   : > { %4623 = vmatpush3.msra.mxu1 %v1957_v41 }
 0x2c8   : > { %4625 = vmatmul.mubr.msk.f32.vlgmr.msra.gmra.mxu1 %vm1859_vm1, %v1841_v28 }
 0x2c9   : > { %4627 = vmatprep.mubr.msk.f32.mxu1 %vm1859_vm1, %v1842_v30 }
 0x2cc   : > { %4628 = vmatmul.mubr.msk.f32.gmra.mxu1 %vm1859_vm1, %v1843_v34 }
 0x373   : > { %v4648_v58 = vpop.f32.mrf.mxu0 }
 0x374   : > { %v5553_v22 = vadd.f32 %v4648_v58, %v4267_v9 }
 0x375   : > { %v2138_v4 = vpop.f32.mrf.mxu0 }
 0x376   : > { %v5564_v25 = vadd.f32 %v4267_v9, %v2138_v4  ;;  %v2481_v28 = vmul.f32 %v4281_v63, %v5553_v22  ;;  %v3084_v34 = vmul.f32 %v5493_v54, %v5553_v22 }
 0x377   : > { %v4651_v10 = vpop.f32.mrf.mxu0 }
 0x378   : > { %v5470_v42 = vpop.f32.mrf.mxu1  ;;  %v5531_v13 = vadd.f32 %v4651_v10, %v4267_v9  ;;  %v2480_v29 = vmul.f32 %v4281_v63, %v5564_v25  ;;  %v3083_v35 = vmul.f32 %v5493_v54, %v5564_v25 }
 0x379   : > { %v2148_v16 = vpop.f32.mrf.mxu0  ;;  %v5550_v21 = vadd.f32 %v5470_v42, %v5475_v43 }
 0x37a   : > { %v1938_v44 = vpop.f32.mrf.mxu1  ;;  %v2483_v17 = vmul.f32 %v4281_v63, %v5531_v13  ;;  %v5543_v19 = vadd.f32 %v4267_v9, %v2148_v16  ;;  %v3086_v32 = vmul.f32 %v5493_v54, %v5531_v13  ;;  %v5610_v36 = vmul.f32 %v5501_v62, %v5531_v13 }
 0x37b   : > { %v5478_v45 = vadd.f32 %v5475_v43, %v1938_v44 }
 0x37c   : > { %v5484_v48 = vpop.f32.mrf.mxu1  ;;  %v2482_v24 = vmul.f32 %v4281_v63, %v5543_v19  ;;  %v3085_v33 = vmul.f32 %v5493_v54, %v5543_v19 }
 0x37d   : > { %4660 = vmatprep.mubr.msk.f32.mxu1 %vm1859_vm1, %v5478_v45  ;;  %4674 = vmatprep.mubr.msk.f32.mxu0 %vm1859_vm1, %v5478_v45  ;;  %v5573_v27 = vadd.f32 %v5484_v48, %v5475_v43 }
 0x37e   : > { %v5486_v49 = vpop.f32.mrf.mxu1 }
 0x37f   : > { %v5557_v23 = vadd.f32 %v5475_v43, %v5486_v49  ;;  %v5626_v49 = vld [vmem:[%s5977_s11 + $0x18] sm:$0xff] }
 0x388   : > { %v4626_v51 = vpop.f32.mrf.mxu1 }
 0x389   : > { %v5491_v52 = vadd.f32 %v4626_v51, %v4262_v50 }
 0x38a   : > { %v2038_v55 = vpop.f32.mrf.mxu1 }
 0x38b   : > { %v5495_v56 = vadd.f32 %v4262_v50, %v2038_v55  ;;  %v5499_v59 = vmul.f32 %v5493_v54, %v5491_v52  ;;  %v2169_v11 = vmul.f32 %v5501_v62, %v5491_v52  ;;  %v2336_v12 = vmul.f32 %v4281_v63, %v5491_v52 }
 0x38c   : > { %v4629_v57 = vpop.f32.mrf.mxu1  ;;  %v2684_v30 = vmul.f32 %v5541_v18, %v5491_v52 }
 0x38d   : > { %v2054_v60 = vadd.f32 %v4629_v57, %v4262_v50  ;;  %v5505_v0 = vmul.f32 %v5493_v54, %v5495_v56  ;;  %v2168_v14 = vmul.f32 %v5501_v62, %v5495_v56  ;;  %v2335_v15 = vmul.f32 %v4281_v63, %v5495_v56 }
 0x38e   : > { %v2048_v61 = vpop.f32.mrf.mxu1  ;;  %v2683_v31 = vmul.f32 %v5541_v18, %v5495_v56 }
 0x38f   : > { %v2049_v1 = vadd.f32 %v4262_v50, %v2048_v61  ;;  %v2171_v2 = vmul.f32 %v5501_v62, %v2054_v60  ;;  %v2338_v3 = vmul.f32 %v4281_v63, %v2054_v60  ;;  %v5509_v5 = vmul.f32 %v5493_v54, %v2054_v60 }
 0x390   : > { %v2686_v20 = vmul.f32 %v5541_v18, %v2054_v60 }
 0x391   : > { %4652 = vmatprep.subr.msk.mxu1 %vm1859_vm1, %v2171_v2  ;;  %4666 = vmatprep.subr.msk.mxu0 %vm1859_vm1, %v2338_v3  ;;  %v2170_v6 = vmul.f32 %v5501_v62, %v2049_v1  ;;  %v2337_v7 = vmul.f32 %v4281_v63, %v2049_v1  ;;  %v5517_v8 = vmul.f32 %v5493_v54, %v2049_v1 }
 0x392   : > { %4653 = vmatpush3.xpose.msk.msra.mxu1 %vm1859_vm1, %v2171_v2  ;;  %4667 = vmatpush3.xpose.msk.msra.mxu0 %vm1859_vm1, %v2338_v3  ;;  %v2685_v26 = vmul.f32 %v5541_v18, %v2049_v1 }
 0x393   : > { %4654 = vmatprep.subr.msk.mxu1 %vm1859_vm1, %v2170_v6  ;;  %4668 = vmatprep.subr.msk.mxu0 %vm1859_vm1, %v2337_v7 }
 0x396   : > { %4655 = vmatpush3.xpose.msk.msra.mxu1 %vm1859_vm1, %v2170_v6  ;;  %4669 = vmatpush3.xpose.msk.msra.mxu0 %vm1859_vm1, %v2337_v7 }
 0x397   : > { %4656 = vmatprep.subr.msk.mxu1 %vm1859_vm1, %v2169_v11  ;;  %4670 = vmatprep.subr.msk.mxu0 %vm1859_vm1, %v2336_v12 }
 0x39a   : > { %4657 = vmatpush3.xpose.msk.msra.mxu1 %vm1859_vm1, %v2169_v11  ;;  %4671 = vmatpush3.xpose.msk.msra.mxu0 %vm1859_vm1, %v2336_v12 }
 0x39b   : > { %4658 = vmatprep.subr.msk.mxu1 %vm1859_vm1, %v2168_v14  ;;  %4672 = vmatprep.subr.msk.mxu0 %vm1859_vm1, %v2335_v15 }
 0x39e   : > { %4659 = vmatpush3.xpose.msk.msra.mxu1 %vm1859_vm1, %v2168_v14  ;;  %4673 = vmatpush3.xpose.msk.msra.mxu0 %vm1859_vm1, %v2335_v15 }
 0x39f   : > { %4708 = vmatprep.subr.msk.mxu0 %vm1859_vm1, %v2686_v20  ;;  %4680 = vmatprep.subr.mxu1 %v2483_v17 }
 0x3a1   : > { %4661 = vmatmul.mubr.msk.f32.vlgmr.msra.gmra.mxu1 %vm1859_vm1, %v5550_v21  ;;  %4675 = vmatmul.mubr.msk.f32.vlgmr.msra.gmra.mxu0 %vm1859_vm1, %v5550_v21 }
 0x3a2   : > { %4663 = vmatprep.mubr.msk.f32.mxu1 %vm1859_vm1, %v5557_v23  ;;  %4677 = vmatprep.mubr.msk.f32.mxu0 %vm1859_vm1, %v5557_v23 }
 0x3a3   : > { %4709 = vmatpush3.xpose.msk.msra.mxu0 %vm1859_vm1, %v2686_v20  ;;  %4681 = vmatpush3.msra.mxu1 %v2483_v17 }
 0x3a4   : > { %4710 = vmatprep.subr.msk.mxu0 %vm1859_vm1, %v2685_v26  ;;  %4682 = vmatprep.subr.mxu1 %v2482_v24 }
 0x3a5   : > { %4664 = vmatmul.mubr.msk.f32.gmra.mxu1 %vm1859_vm1, %v5573_v27  ;;  %4678 = vmatmul.mubr.msk.f32.gmra.mxu0 %vm1859_vm1, %v5573_v27 }
 0x3a6   : > { %4716 = vmatprep.mubr.msk.f32.mxu0 %vm1859_vm1, %v5478_v45  ;;  %4683 = vmatpush3.msra.mxu1 %v2482_v24 }
 0x3a7   : > { %4711 = vmatpush3.xpose.msk.msra.mxu0 %vm1859_vm1, %v2685_v26  ;;  %4684 = vmatprep.subr.mxu1 %v2481_v28 }
 0x3a8   : > { %4712 = vmatprep.subr.msk.mxu0 %vm1859_vm1, %v2684_v30  ;;  %4685 = vmatpush3.msra.mxu1 %v2481_v28 }
 0x3a9   : > { %4686 = vmatprep.subr.mxu1 %v2480_v29 }
 0x3aa   : > { %4687 = vmatpush3.msra.mxu1 %v2480_v29 }
 0x3ab   : > { %4713 = vmatpush3.xpose.msk.msra.mxu0 %vm1859_vm1, %v2684_v30  ;;  %4694 = vmatprep.subr.mxu1 %v5610_v36 }
 0x3ac   : > { %4714 = vmatprep.subr.msk.mxu0 %vm1859_vm1, %v2683_v31 }
 0x3af   : > { %4715 = vmatpush3.xpose.msk.msra.mxu0 %vm1859_vm1, %v2683_v31 }
 0x3b0   : > { %4750 = vmatprep.subr.mxu0 %v3086_v32 }
 0x3b2   : > { %4717 = vmatmul.mubr.msk.f32.vlgmr.msra.gmra.mxu0 %vm1859_vm1, %v5550_v21 }
 0x3b3   : > { %4719 = vmatprep.mubr.msk.f32.mxu0 %vm1859_vm1, %v5557_v23  ;;  %4751 = vmatpush3.msra.mxu0 %v3086_v32 }
 0x3b4   : > { %4752 = vmatprep.subr.mxu0 %v3085_v33 }
 0x3b5   : > { %4753 = vmatpush3.msra.mxu0 %v3085_v33 }
 0x3b6   : > { %4720 = vmatmul.mubr.msk.f32.gmra.mxu0 %vm1859_vm1, %v5573_v27  ;;  %4754 = vmatprep.subr.mxu0 %v3084_v34 }
 0x3b7   : > { %4755 = vmatpush3.msra.mxu0 %v3084_v34 }
 0x3b8   : > { %4756 = vmatprep.subr.mxu0 %v3083_v35 }
 0x3b9   : > { %4757 = vmatpush3.msra.mxu0 %v3083_v35 }
 0x461   : > { %v4662_v37 = vpop.f32.mrf.mxu1  ;;  %v4676_v38 = vpop.f32.mrf.mxu0 }
 0x462   : > { %v2423_v47 = vadd.f32 %v4676_v38, %v5617_v40  ;;  %v2268_v58 = vadd.f32 %v4662_v37, %v5617_v40 }
 0x463   : > { %v2262_v41 = vpop.f32.mrf.mxu1  ;;  %v2417_v42 = vpop.f32.mrf.mxu0 }
 0x464   : > { %v2418_v43 = vadd.f32 %v2417_v42, %v5614_v39  ;;  %v2263_v53 = vadd.f32 %v2262_v41, %v5614_v39  ;;  %v2439_v56 = vsel %vm2281_vm12, %v2423_v47, -inf  ;;  %v2285_v3 = vsel %vm2281_vm12, %v2268_v58, -inf }
 0x465   : > { %v4679_v44 = vpop.f32.mrf.mxu0  ;;  %v4665_v50 = vpop.f32.mrf.mxu1 }
 0x466   : > { %v2436_v48 = vsel %vm2281_vm12, %v2418_v43, -inf  ;;  %v2433_v54 = vadd.f32 %v4679_v44, %v5626_v49  ;;  %v2282_v63 = vsel %vm2281_vm12, %v2263_v53, -inf  ;;  %v2278_v1 = vadd.f32 %v4665_v50, %v5626_v49 }
 0x467   : > { %v2427_v51 = vpop.f32.mrf.mxu0  ;;  %2437 = vmax.xlane.f32.xlu0 %v2436_v48  ;;  %v2272_v57 = vpop.f32.mrf.mxu1 }
 0x468   : > { %v2428_v52 = vadd.f32 %v2427_v51, %v5621_v46  ;;  %v2273_v60 = vadd.f32 %v2272_v57, %v5621_v46  ;;  %v2445_v61 = vsel %vm2281_vm12, %v2433_v54, -inf  ;;  %v2291_v11 = vsel %vm2281_vm12, %v2278_v1, -inf }
 0x46a   : > { %v2442_v55 = vsel %vm2281_vm12, %v2428_v52, -inf  ;;  %v2288_v4 = vsel %vm2281_vm12, %v2273_v60, -inf }
 0x46b   : > { %2443 = vmax.xlane.f32.xlu1 %v2442_v55  ;;  %2440 = vmax.xlane.f32.xlu0 %v2439_v56 }
 0x46f   : > { %2446 = vmax.xlane.f32.xlu1 %v2445_v61  ;;  %2283 = vmax.xlane.f32.xlu0 %v2282_v63 }
 0x472   : > { %v4718_v2 = vpop.f32.mrf.mxu0 }
 0x473   : > { %2286 = vmax.xlane.f32.xlu1 %v2285_v3  ;;  %2289 = vmax.xlane.f32.xlu0 %v2288_v4  ;;  %v2771_v9 = vadd.f32 %v4718_v2, %v5617_v40 }
 0x474   : > { %v2765_v6 = vpop.f32.mrf.mxu0 }
 0x475   : > { %v2766_v7 = vadd.f32 %v2765_v6, %v5614_v39  ;;  %v2787_v17 = vsel %vm2281_vm12, %v2771_v9, -inf }
 0x476   : > { %v4721_v10 = vpop.f32.mrf.mxu0 }
 0x477   : > { %2292 = vmax.xlane.f32.xlu1 %v2291_v11  ;;  %v2784_v12 = vsel %vm2281_vm12, %v2766_v7, -inf  ;;  %v5646_v16 = vadd.f32 %v4721_v10, %v5626_v49 }
 0x478   : > { %v2775_v14 = vpop.f32.mrf.mxu0  ;;  %2785 = vmax.xlane.f32.xlu0 %v2784_v12 }
 0x479   : > { %v2776_v15 = vadd.f32 %v2775_v14, %v5621_v46  ;;  %v2793_v24 = vsel %vm2281_vm12, %v5646_v16, -inf }
 0x47b   : > { %2788 = vmax.xlane.f32.xlu1 %v2787_v17  ;;  %v2790_v20 = vsel %vm2281_vm12, %v2776_v15, -inf }
 0x47c   : > { %2791 = vmax.xlane.f32.xlu0 %v2790_v20 }
 0x47f   : > { %2794 = vmax.xlane.f32.xlu1 %v2793_v24 }
 0x4f0   : > { %v2438_v26 = vpop.xlane.xlu0 %2437 }
 0x4f1   : > { %v2448_v28 = vsub.f32 %v2418_v43, %v2438_v26 }
 0x4f3   : > { %v2452_v29 = vmul.f32 1.442695, %v2448_v28 }
 0x4f4   : > { %v2444_v30 = vpop.xlane.xlu1 %2443  ;;  %v2441_v31 = vpop.xlane.xlu0 %2440 }
 0x4f5   : > { %5003 = vpow2.f32 %v2452_v29  ;;  %v2450_v32 = vsub.f32 %v2428_v52, %v2444_v30  ;;  %v2449_v33 = vsub.f32 %v2423_v47, %v2441_v31 }
 0x4f7   : > { %v2456_v34 = vmul.f32 1.442695, %v2450_v32  ;;  %v2454_v35 = vmul.f32 1.442695, %v2449_v33 }
 0x4f8   : > { %v2447_v37 = vpop.xlane.xlu1 %2446  ;;  %v2284_v38 = vpop.xlane.xlu0 %2283 }
 0x4f9   : > { %5005 = vpow2.f32 %v2456_v34  ;;  %v2451_v41 = vsub.f32 %v2433_v54, %v2447_v37  ;;  %v2294_v42 = vsub.f32 %v2263_v53, %v2284_v38 }
 0x4fa   : > { %5007 = vpow2.f32 %v2454_v35 }
 0x4fb   : > { %v2458_v44 = vmul.f32 1.442695, %v2451_v41  ;;  %v2298_v48 = vmul.f32 1.442695, %v2294_v42 }
 0x4fc   : > { %v2287_v50 = vpop.xlane.xlu1 %2286  ;;  %v2290_v51 = vpop.xlane.xlu0 %2289 }
 0x4fd   : > { %5009 = vpow2.f32 %v2458_v44  ;;  %v2295_v43 = vsub.f32 %v2268_v58, %v2287_v50  ;;  %v2296_v55 = vsub.f32 %v2273_v60, %v2290_v51 }
 0x4fe   : > { %5011 = vpow2.f32 %v2298_v48 }
 0x4ff   : > { %v2300_v56 = vmul.f32 1.442695, %v2295_v43  ;;  %v2302_v57 = vmul.f32 1.442695, %v2296_v55 }
 0x500   : > { %v2293_v52 = vpop.xlane.xlu1 %2292 }
 0x501   : > { %5013 = vpow2.f32 %v2300_v56  ;;  %v2297_v47 = vsub.f32 %v2278_v1, %v2293_v52  ;;  %v2786_v61 = vpop.xlane.xlu0 %2785 }
 0x502   : > { %v5652_v63 = vpop.eup %5003  ;;  %5015 = vpow2.f32 %v2302_v57  ;;  %v2796_v54 = vsub.f32 %v2766_v7, %v2786_v61 }
 0x503   : > { %v2304_v53 = vmul.f32 1.442695, %v2297_v47  ;;  %v2460_v2 = vsel %vm2281_vm12, %v5652_v63, 0.0 }
 0x504   : > { %v2800_v3 = vmul.f32 1.442695, %v2796_v54  ;;  %v2789_v4 = vpop.xlane.xlu1 %2788  ;;  %2461 = vadd.xlane.f32.xlu0 %v2460_v2 }
 0x505   : > { %5017 = vpow2.f32 %v2304_v53  ;;  %v2797_v58 = vsub.f32 %v2771_v9, %v2789_v4  ;;  %v2792_v60 = vpop.xlane.xlu0 %2791 }
 0x506   : > { %v5656_v6 = vpop.eup %5005  ;;  %5019 = vpow2.f32 %v2800_v3  ;;  %v2798_v10 = vsub.f32 %v2776_v15, %v2792_v60 }
 0x507   : > { %v5658_v1 = vpop.eup %5007  ;;  %v2802_v11 = vmul.f32 1.442695, %v2797_v58  ;;  %v2466_v7 = vsel %vm2281_vm12, %v5656_v6, 0.0 }
 0x508   : > { %v2804_v12 = vmul.f32 1.442695, %v2798_v10  ;;  %v2463_v14 = vsel %vm2281_vm12, %v5658_v1, 0.0  ;;  %v2795_v17 = vpop.xlane.xlu1 %2794  ;;  %2467 = vadd.xlane.f32.xlu0 %v2466_v7 }
 0x509   : > { %5021 = vpow2.f32 %v2802_v11  ;;  %2464 = vadd.xlane.f32.xlu1 %v2463_v14  ;;  %v2799_v9 = vsub.f32 %v5646_v16, %v2795_v17 }
 0x50a   : > { %v5665_v20 = vpop.eup %5009  ;;  %5023 = vpow2.f32 %v2804_v12 }
 0x50b   : > { %v5667_v15 = vpop.eup %5011  ;;  %v2806_v24 = vmul.f32 1.442695, %v2799_v9  ;;  %v2469_v26 = vsel %vm2281_vm12, %v5665_v20, 0.0 }
 0x50c   : > { %v2306_v28 = vsel %vm2281_vm12, %v5667_v15, 0.0 }
 0x50d   : > { %5025 = vpow2.f32 %v2806_v24  ;;  %2470 = vadd.xlane.f32.xlu1 %v2469_v26  ;;  %2307 = vadd.xlane.f32.xlu0 %v2306_v28 }
 0x50e   : > { %v5673_v29 = vpop.eup %5013 }
 0x50f   : > { %v5675_v30 = vpop.eup %5015  ;;  %v2309_v16 = vsel %vm2281_vm12, %v5673_v29, 0.0 }
 0x510   : > { %v2312_v31 = vsel %vm2281_vm12, %v5675_v30, 0.0 }
 0x511   : > { %2310 = vadd.xlane.f32.xlu1 %v2309_v16  ;;  %2313 = vadd.xlane.f32.xlu0 %v2312_v31 }
 0x512   : > { %v5681_v32 = vpop.eup %5017 }
 0x513   : > { %v5683_v33 = vpop.eup %5019  ;;  %v2315_v34 = vsel %vm2281_vm12, %v5681_v32, 0.0 }
 0x514   : > { %v2808_v35 = vsel %vm2281_vm12, %v5683_v33, 0.0 }
 0x515   : > { %2316 = vadd.xlane.f32.xlu1 %v2315_v34  ;;  %2809 = vadd.xlane.f32.xlu0 %v2808_v35 }
 0x516   : > { %v5689_v37 = vpop.eup %5021 }
 0x517   : > { %v5691_v38 = vpop.eup %5023  ;;  %v2811_v41 = vsel %vm2281_vm12, %v5689_v37, 0.0 }
 0x518   : > { %v2814_v42 = vsel %vm2281_vm12, %v5691_v38, 0.0 }
 0x519   : > { %2812 = vadd.xlane.f32.xlu1 %v2811_v41  ;;  %2815 = vadd.xlane.f32.xlu0 %v2814_v42 }
 0x51a   : > { %v5697_v44 = vpop.eup %5025 }
 0x51b   : > { %v2817_v48 = vsel %vm2281_vm12, %v5697_v44, 0.0 }
 0x51d   : > { %2818 = vadd.xlane.f32.xlu1 %v2817_v48 }
 0x58d   : > { %v2462_v50 = vpop.xlane.xlu0 %2461 }
 0x58e   : > { %5027 = vrcp.f32 %v2462_v50 }
 0x591   : > { %v2468_v51 = vpop.xlane.xlu0 %2467 }
 0x592   : > { %v2465_v43 = vpop.xlane.xlu1 %2464  ;;  %5029 = vrcp.f32 %v2468_v51 }
 0x593   : > { %5031 = vrcp.f32 %v2465_v43 }
 0x596   : > { %v2471_v55 = vpop.xlane.xlu1 %2470  ;;  %v2308_v56 = vpop.xlane.xlu0 %2307 }
 0x597   : > { %5033 = vrcp.f32 %v2471_v55 }
 0x598   : > { %5035 = vrcp.f32 %v2308_v56 }
 0x59a   : > { %v2311_v57 = vpop.xlane.xlu1 %2310  ;;  %v2314_v52 = vpop.xlane.xlu0 %2313 }
 0x59b   : > { %v5028_v47 = vpop.eup %5027  ;;  %5037 = vrcp.f32 %v2311_v57 }
 0x59c   : > { %5039 = vrcp.f32 %v2314_v52  ;;  %v2473_v61 = vmul.f32 %v5028_v47, %v5652_v63  ;;  %v2328_v63 = vmul.f32 %v5501_v62, %v5543_v19 }
 0x59e   : > { %v2317_v54 = vpop.xlane.xlu1 %2316  ;;  %v2810_v53 = vpop.xlane.xlu0 %2809  ;;  %4688 = vmatprep.mubr.msk.f32.mxu1 %vm2281_vm12, %v2473_v61 }
 0x59f   : > { %v5030_v2 = vpop.eup %5029  ;;  %5041 = vrcp.f32 %v2317_v54 }
 0x5a0   : > { %v5032_v3 = vpop.eup %5031  ;;  %5043 = vrcp.f32 %v2810_v53  ;;  %v2477_v4 = vmul.f32 %v5030_v2, %v5656_v6  ;;  %v2327_v6 = vmul.f32 %v5501_v62, %v5553_v22 }
 0x5a1   : > { %v2475_v58 = vmul.f32 %v5032_v3, %v5658_v1 }
 0x5a2   : > { %v2813_v60 = vpop.xlane.xlu1 %2812  ;;  %v2816_v10 = vpop.xlane.xlu0 %2815 }
 0x5a3   : > { %5045 = vrcp.f32 %v2813_v60  ;;  %4689 = vmatmul.mubr.msk.f32.vlgmr.msra.gmra.mxu1 %vm2281_vm12, %v2475_v58 }
 0x5a4   : > { %v5034_v11 = vpop.eup %5033  ;;  %5047 = vrcp.f32 %v2816_v10  ;;  %4695 = vmatpush3.msra.mxu1 %v5610_v36  ;;  %4691 = vmatprep.mubr.msk.f32.mxu1 %vm2281_vm12, %v2477_v4  ;;  %v2326_v36 = vmul.f32 %v5501_v62, %v5564_v25  ;;  %v2830_v62 = vmul.f32 %v5541_v18, %v5543_v19  ;;  %v2828_v19 = vmul.f32 %v5541_v18, %v5564_v25 }
 0x5a5   : > { %v5036_v7 = vpop.eup %5035  ;;  %4696 = vmatprep.subr.mxu1 %v2328_v63  ;;  %v2479_v1 = vmul.f32 %v5034_v11, %v5665_v20  ;;  %v2831_v20 = vmul.f32 %v5541_v18, %v5531_v13 }
 0x5a6   : > { %4697 = vmatpush3.msra.mxu1 %v2328_v63  ;;  %v2819_v12 = vpop.xlane.xlu1 %2818  ;;  %v2319_v14 = vmul.f32 %v5036_v7, %v5667_v15 }
 0x5a7   : > { %5049 = vrcp.f32 %v2819_v12  ;;  %4698 = vmatprep.subr.mxu1 %v2327_v6  ;;  %4692 = vmatmul.mubr.msk.f32.gmra.mxu1 %vm2281_vm12, %v2479_v1 }
 0x5a8   : > { %v5038_v17 = vpop.eup %5037  ;;  %4699 = vmatpush3.msra.mxu1 %v2327_v6  ;;  %4702 = vmatprep.mubr.msk.f32.mxu1 %vm2281_vm12, %v2319_v14 }
 0x5a9   : > { %v5040_v9 = vpop.eup %5039  ;;  %v2321_v24 = vmul.f32 %v5038_v17, %v5673_v29  ;;  %4700 = vmatprep.subr.mxu1 %v2326_v36  ;;  %v2829_v29 = vmul.f32 %v5541_v18, %v5553_v22 }
 0x5aa   : > { %4701 = vmatpush3.msra.mxu1 %v2326_v36  ;;  %v2323_v15 = vmul.f32 %v5040_v9, %v5675_v30 }
 0x5ab   : > { %4722 = vmatprep.subr.mxu1 %v2831_v20  ;;  %4703 = vmatmul.mubr.msk.f32.vlgmr.msra.gmra.mxu1 %vm2281_vm12, %v2321_v24 }
 0x5ac   : > { %v5042_v26 = vpop.eup %5041  ;;  %4723 = vmatpush3.msra.mxu1 %v2831_v20  ;;  %4705 = vmatprep.mubr.msk.f32.mxu1 %vm2281_vm12, %v2323_v15 }
 0x5ad   : > { %v5044_v28 = vpop.eup %5043  ;;  %4724 = vmatprep.subr.mxu1 %v2830_v62  ;;  %v2325_v13 = vmul.f32 %v5042_v26, %v5681_v32  ;;  %v3195_v26 = vld [vmem:[%s5334_s15 + $0x38] sm:$0xff] }
 0x5ae   : > { %4725 = vmatpush3.msra.mxu1 %v2830_v62  ;;  %v2821_v30 = vmul.f32 %v5044_v28, %v5683_v33  ;;  %4764 = vmatprep.subr.mxu0 %v3195_v26 }
 0x5af   : > { %4726 = vmatprep.subr.mxu1 %v2829_v29  ;;  %4706 = vmatmul.mubr.msk.f32.gmra.mxu1 %vm2281_vm12, %v2325_v13 }
 0x5b0   : > { %v5046_v16 = vpop.eup %5045  ;;  %4727 = vmatpush3.msra.mxu1 %v2829_v29  ;;  %4730 = vmatprep.mubr.msk.f32.mxu1 %vm2281_vm12, %v2821_v30 }
 0x5b1   : > { %v5048_v31 = vpop.eup %5047  ;;  %v2823_v34 = vmul.f32 %v5046_v16, %v5689_v37  ;;  %4728 = vmatprep.subr.mxu1 %v2828_v19 }
 0x5b2   : > { %4729 = vmatpush3.msra.mxu1 %v2828_v19  ;;  %v2825_v22 = vmul.f32 %v5048_v31, %v5691_v38 }
 0x5b3   : > { %4736 = vmatprep.subr.msk.mxu1 %vm1859_vm1, %v5509_v5  ;;  %4731 = vmatmul.mubr.msk.f32.vlgmr.msra.gmra.mxu1 %vm2281_vm12, %v2823_v34 }
 0x5b4   : > { %v5050_v32 = vpop.eup %5049  ;;  %4737 = vmatpush3.xpose.msk.msra.mxu1 %vm1859_vm1, %v5509_v5  ;;  %4733 = vmatprep.mubr.msk.f32.mxu1 %vm2281_vm12, %v2825_v22 }
 0x5b5   : > { %4738 = vmatprep.subr.msk.mxu1 %vm1859_vm1, %v5517_v8  ;;  %v2827_v18 = vmul.f32 %v5050_v32, %v5697_v44  ;;  %v3194_v32 = vld [vmem:[%s5334_s15 + $0x30] sm:$0xff] }
 0x5b7   : > { %4734 = vmatmul.mubr.msk.f32.gmra.mxu1 %vm2281_vm12, %v2827_v18 }
 0x5b8   : > { %4739 = vmatpush3.xpose.msk.msra.mxu1 %vm1859_vm1, %v5517_v8  ;;  %4744 = vmatprep.mubr.msk.f32.mxu1 %vm1859_vm1, %v5478_v45 }
 0x5b9   : > { %4740 = vmatprep.subr.msk.mxu1 %vm1859_vm1, %v5499_v59 }
 0x5bc   : > { %4741 = vmatpush3.xpose.msk.msra.mxu1 %vm1859_vm1, %v5499_v59 }
 0x5bd   : > { %4742 = vmatprep.subr.msk.mxu1 %vm1859_vm1, %v5505_v0 }
 0x5c0   : > { %4743 = vmatpush3.xpose.msk.msra.mxu1 %vm1859_vm1, %v5505_v0 }
 0x5c3   : > { %4745 = vmatmul.mubr.msk.f32.vlgmr.msra.gmra.mxu1 %vm1859_vm1, %v5550_v21 }
 0x5c4   : > { %4747 = vmatprep.mubr.msk.f32.mxu1 %vm1859_vm1, %v5557_v23 }
 0x5c7   : > { %4748 = vmatmul.mubr.msk.f32.gmra.mxu1 %vm1859_vm1, %v5573_v27 }
 0x663   : > { %v4690_v45 = vpop.f32.mrf.mxu1 }
 0x665   : > { %v2562_v5 = vpop.f32.mrf.mxu1 }
 0x667   : > { %v4693_v8 = vpop.f32.mrf.mxu1 }
 0x669   : > { %v2572_v25 = vpop.f32.mrf.mxu1 }
 0x66b   : > { %v4704_v59 = vpop.f32.mrf.mxu1 }
 0x66c   : > { %v2665_v33 = vadd.f32 %v4704_v59, %v4690_v45  ;;  %v3191_v59 = vld [vmem:[%s5334_s15 + $0x18] sm:$0xff] }
 0x66d   : > { %v2659_v35 = vpop.f32.mrf.mxu1 }
 0x66e   : > { %v2660_v37 = vadd.f32 %v2659_v35, %v2562_v5  ;;  %v3193_v5 = vld [vmem:[%s5334_s15 + $0x28] sm:$0xff] }
 0x66f   : > { %v4707_v38 = vpop.f32.mrf.mxu1  ;;  %v3189_v35 = vld [vmem:[%s5334_s15 + $0x8] sm:$0xff] }
 0x670   : > { %v2675_v41 = vadd.f32 %v4707_v38, %v4693_v8 }
 0x671   : > { %v2669_v0 = vpop.f32.mrf.mxu1 }
 0x672   : > { %v2670_v42 = vadd.f32 %v2669_v0, %v2572_v25  ;;  %v3192_v25 = vld [vmem:[%s5334_s15 + $0x20] sm:$0xff] }
 0x673   : > { %v4732_v44 = vpop.f32.mrf.mxu1 }
 0x674   : > { %v5764_v21 = vadd.f32 %v4732_v44, %v2665_v33  ;;  %v3190_v33 = vld [vmem:[%s5334_s15 + $0x10] sm:$0xff] }
 0x675   : > { %v2910_v48 = vpop.f32.mrf.mxu1 }
 0x676   : > { %v5766_v23 = vadd.f32 %v2910_v48, %v2660_v37  ;;  %v3188_v37 = vld [vmem:[%s5334_s15] sm:$0xff] }
 0x677   : > { %v4735_v50 = vpop.f32.mrf.mxu1 }
 0x678   : > { %v5768_v27 = vadd.f32 %v4735_v50, %v2675_v41 }
 0x679   : > { %v2920_v51 = vpop.f32.mrf.mxu1 }
 0x67a   : > { %v5770_v43 = vadd.f32 %v2920_v51, %v2670_v42 }
 0x683   : > { %v4746_v55 = vpop.f32.mrf.mxu1 }
 0x684   : > { %v3026_v56 = vadd.f32 %v4746_v55, %v5617_v40  ;;  %v4324_v55 = vld [vmem:[%s1155_s16] ss:$0 sm:$0xff] }
 0x685   : > { %v3020_v57 = vpop.f32.mrf.mxu1 }
 0x686   : > { %v3021_v52 = vadd.f32 %v3020_v57, %v5614_v39  ;;  %v3042_v47 = vsel %vm2281_vm12, %v3026_v56, -inf }
 0x687   : > { %3043 = vmax.xlane.f32.xlu1 %v3042_v47  ;;  %v4749_v61 = vpop.f32.mrf.mxu1 }
 0x688   : > { %v3036_v54 = vadd.f32 %v4749_v61, %v5626_v49  ;;  %v3039_v53 = vsel %vm2281_vm12, %v3021_v52, -inf }
 0x689   : > { %v3030_v2 = vpop.f32.mrf.mxu1  ;;  %3040 = vmax.xlane.f32.xlu0 %v3039_v53 }
 0x68a   : > { %v3031_v3 = vadd.f32 %v3030_v2, %v5621_v46  ;;  %v3048_v4 = vsel %vm2281_vm12, %v3036_v54, -inf  ;;  %v5092_v2 = vld [vmem:[#allocation2] sm:$0xff] }
 0x68b   : > { %3049 = vmax.xlane.f32.xlu1 %v3048_v4 }
 0x68c   : > { %v3045_v40 = vsel %vm2281_vm12, %v3031_v3, -inf }
 0x68d   : > { %3046 = vmax.xlane.f32.xlu0 %v3045_v40  ;;  %v5093_v40 = vld [vmem:[#allocation2 + $0x18] sm:$0xff] }
 0x710   : > { %v3044_v58 = vpop.xlane.xlu1 %3043 }
 0x711   : > { %v3052_v39 = vsub.f32 %v3026_v56, %v3044_v58 }
 0x712   : > { %v3041_v60 = vpop.xlane.xlu0 %3040 }
 0x713   : > { %v3057_v10 = vmul.f32 1.442695, %v3052_v39  ;;  %v3051_v63 = vsub.f32 %v3021_v52, %v3041_v60  ;;  %v5091_v52 = vld [vmem:[#allocation2 + $0x8] sm:$0xff]  ;;  %v5094_v60 = vld [vmem:[#allocation2 + $0x10] sm:$0xff] }
 0x714   : > { %v3050_v11 = vpop.xlane.xlu1 %3049 }
 0x715   : > { %5051 = vpow2.f32 %v3057_v10  ;;  %v3055_v49 = vmul.f32 1.442695, %v3051_v63  ;;  %v3054_v7 = vsub.f32 %v3036_v54, %v3050_v11 }
 0x716   : > { %v3047_v6 = vpop.xlane.xlu0 %3046 }
 0x717   : > { %5053 = vpow2.f32 %v3055_v49  ;;  %v3061_v1 = vmul.f32 1.442695, %v3054_v7  ;;  %v3053_v12 = vsub.f32 %v3031_v3, %v3047_v6 }
 0x719   : > { %5055 = vpow2.f32 %v3061_v1  ;;  %v3059_v46 = vmul.f32 1.442695, %v3053_v12 }
 0x71b   : > { %5057 = vpow2.f32 %v3059_v46 }
 0x722   : > { %v5052_v14 = vpop.eup %5051 }
 0x723   : > { %v3066_v36 = vsel %vm2281_vm12, %v5052_v14, 0.0 }
 0x724   : > { %v5054_v17 = vpop.eup %5053  ;;  %3067 = vadd.xlane.f32.xlu1 %v3066_v36 }
 0x725   : > { %v3063_v9 = vsel %vm2281_vm12, %v5054_v17, 0.0 }
 0x726   : > { %v5056_v24 = vpop.eup %5055  ;;  %3064 = vadd.xlane.f32.xlu0 %v3063_v9 }
 0x727   : > { %v3072_v20 = vsel %vm2281_vm12, %v5056_v24, 0.0 }
 0x728   : > { %v5058_v15 = vpop.eup %5057  ;;  %3073 = vadd.xlane.f32.xlu1 %v3072_v20 }
 0x729   : > { %v3069_v62 = vsel %vm2281_vm12, %v5058_v15, 0.0 }
 0x72a   : > { %3070 = vadd.xlane.f32.xlu0 %v3069_v62 }
 0x7ad   : > { %v3068_v28 = vpop.xlane.xlu1 %3067 }
 0x7ae   : > { %5059 = vrcp.f32 %v3068_v28 }
 0x7af   : > { %v3065_v29 = vpop.xlane.xlu0 %3064 }
 0x7b0   : > { %5061 = vrcp.f32 %v3065_v29 }
 0x7b1   : > { %v3074_v13 = vpop.xlane.xlu1 %3073 }
 0x7b2   : > { %5063 = vrcp.f32 %v3074_v13 }
 0x7b3   : > { %v3071_v30 = vpop.xlane.xlu0 %3070 }
 0x7b4   : > { %5065 = vrcp.f32 %v3071_v30 }
 0x7bb   : > { %v5060_v19 = vpop.eup %5059 }
 0x7bc   : > { %v3078_v34 = vmul.f32 %v5060_v19, %v5052_v14  ;;  %v3386_v19 = vld [vmem:[%s5343_s17 + $0x38] sm:$0xff] }
 0x7bd   : > { %v5062_v16 = vpop.eup %5061  ;;  %4786 = vmatprep.subr.mxu1 %v3386_v19 }
 0x7be   : > { %v3076_v31 = vmul.f32 %v5062_v16, %v5054_v17  ;;  %4787 = vmatpush3.msra.mxu1 %v3386_v19  ;;  %v3385_v16 = vld [vmem:[%s5343_s17 + $0x30] sm:$0xff] }
 0x7bf   : > { %v5064_v22 = vpop.eup %5063  ;;  %4788 = vmatprep.subr.mxu1 %v3385_v16 }
 0x7c0   : > { %4758 = vmatprep.mubr.msk.f32.mxu0 %vm2281_vm12, %v3076_v31  ;;  %v3082_v8 = vmul.f32 %v5064_v22, %v5056_v24  ;;  %4789 = vmatpush3.msra.mxu1 %v3385_v16  ;;  %v3384_v31 = vld [vmem:[%s5343_s17 + $0x28] sm:$0xff]  ;;  %v3382_v22 = vld [vmem:[%s5343_s17 + $0x18] sm:$0xff] }
 0x7c1   : > { %v5066_v18 = vpop.eup %5065  ;;  %4759 = vmatmul.mubr.msk.f32.vlgmr.msra.gmra.mxu0 %vm2281_vm12, %v3078_v34  ;;  %4790 = vmatprep.subr.mxu1 %v3384_v31  ;;  %v3383_v34 = vld [vmem:[%s5343_s17 + $0x20] sm:$0xff] }
 0x7c2   : > { %v3080_v45 = vmul.f32 %v5066_v18, %v5058_v15  ;;  %4765 = vmatpush3.msra.mxu0 %v3195_v26  ;;  %4791 = vmatpush3.msra.mxu1 %v3384_v31  ;;  %v3380_v18 = vld [vmem:[%s5343_s17 + $0x8] sm:$0xff] }
 0x7c3   : > { %4766 = vmatprep.subr.mxu0 %v3194_v32  ;;  %4792 = vmatprep.subr.mxu1 %v3383_v34 }
 0x7c4   : > { %4761 = vmatprep.mubr.msk.f32.mxu0 %vm2281_vm12, %v3080_v45  ;;  %4767 = vmatpush3.msra.mxu0 %v3194_v32  ;;  %v3381_v32 = vld [vmem:[%s5343_s17 + $0x10] sm:$0xff]  ;;  %v3379_v45 = vld [vmem:[%s5343_s17] sm:$0xff]  ;;  %s5978_s17 = scalar_lea.vmem %s5291_s25, %s5315_s0 }
 0x7c5   : > { %4762 = vmatmul.mubr.msk.f32.gmra.mxu0 %vm2281_vm12, %v3082_v8  ;;  %4768 = vmatprep.subr.mxu0 %v3193_v5 }
 0x7c6   : > { %4769 = vmatpush3.msra.mxu0 %v3193_v5  ;;  %4793 = vmatpush3.msra.mxu1 %v3383_v34 }
 0x7c7   : > { %4770 = vmatprep.subr.mxu0 %v3192_v25  ;;  %4794 = vmatprep.subr.mxu1 %v3382_v22 }
 0x7c8   : > { %4771 = vmatpush3.msra.mxu0 %v3192_v25  ;;  %4795 = vmatpush3.msra.mxu1 %v3382_v22 }
 0x7c9   : > { %4772 = vmatprep.subr.mxu0 %v3191_v59  ;;  %4796 = vmatprep.subr.mxu1 %v3381_v32 }
 0x7ca   : > { %4773 = vmatpush3.msra.mxu0 %v3191_v59  ;;  %4797 = vmatpush3.msra.mxu1 %v3381_v32 }
 0x7cb   : > { %4774 = vmatprep.subr.mxu0 %v3190_v33  ;;  %4798 = vmatprep.subr.mxu1 %v3380_v18 }
 0x7cc   : > { %4775 = vmatpush3.msra.mxu0 %v3190_v33  ;;  %4799 = vmatpush3.msra.mxu1 %v3380_v18 }
 0x7cd   : > { %4776 = vmatprep.subr.mxu0 %v3189_v35  ;;  %4800 = vmatprep.subr.mxu1 %v3379_v45 }
 0x7ce   : > { %4777 = vmatpush3.msra.mxu0 %v3189_v35  ;;  %4801 = vmatpush3.msra.mxu1 %v3379_v45 }
 0x7cf   : > { %4778 = vmatprep.subr.mxu0 %v3188_v37 }
 0x7d0   : > { %4779 = vmatpush3.msra.mxu0 %v3188_v37 }
 0x881   : > { %v4760_v38 = vpop.f32.mrf.mxu0 }
 0x882   : > { %v3185_v42 = vadd.f32 %v4760_v38, %v5764_v21 }
 0x883   : > { %v3165_v41 = vpop.f32.mrf.mxu0 }
 0x884   : > { %v3184_v0 = vadd.f32 %v3165_v41, %v5766_v23 }
 0x885   : > { %v4763_v44 = vpop.f32.mrf.mxu0 }
 0x886   : > { %4780 = vmatprep.mubr.msk.f32.mxu0 %vm1859_vm1, %v3184_v0  ;;  %v3187_v51 = vadd.f32 %v4763_v44, %v5768_v27 }
 0x887   : > { %v3175_v48 = vpop.f32.mrf.mxu0  ;;  %4781 = vmatmul.mubr.msk.f32.vlgmr.msra.gmra.mxu0 %vm1859_vm1, %v3185_v42 }
 0x888   : > { %v3186_v50 = vadd.f32 %v3175_v48, %v5770_v43 }
 0x88a   : > { %4783 = vmatprep.mubr.msk.f32.mxu0 %vm1859_vm1, %v3186_v50 }
 0x88b   : > { %4784 = vmatmul.mubr.msk.f32.gmra.mxu0 %vm1859_vm1, %v3187_v51  ;;  %v4329_v51 = vld [vmem:[%s1158_s18] ss:$0 sm:$0xff] }
 0x947   : > { %v4782_v56 = vpop.f32.mrf.mxu0 }
 0x948   : > { %v3287_v23 = vadd.f32 %v4782_v56, %v4324_v55 }
 0x949   : > { %v3281_v57 = vpop.f32.mrf.mxu0 }
 0x94a   : > { %v3282_v21 = vadd.f32 %v4324_v55, %v3281_v57  ;;  %v3301_v47 = vadd.f32 %v5091_v52, %v3287_v23 }
 0x94b   : > { %v4785_v61 = vpop.f32.mrf.mxu0 }
 0x94c   : > { %v3297_v54 = vadd.f32 %v4785_v61, %v4324_v55  ;;  %v3309_v53 = vsel %vm1859_vm1, %v3301_v47, 0.0  ;;  %v3300_v43 = vadd.f32 %v5092_v2, %v3282_v21  ;;  %v4330_v21 = vld [vmem:[%s1161_s22] ss:$0 sm:$0xff] }
 0x94d   : > { %3310 = vadd.xlane.f32.xlu1 %v3309_v53  ;;  %v3291_v27 = vpop.f32.mrf.mxu0 }
 0x94e   : > { %v3292_v3 = vadd.f32 %v4324_v55, %v3291_v27  ;;  %v3306_v4 = vsel %vm1859_vm1, %v3300_v43, 0.0  ;;  %v3303_v58 = vadd.f32 %v5093_v40, %v3297_v54  ;;  %v3542_v40 = vld [vmem:[%s5349_s28 + $0x78] sm:$0xff] }
 0x94f   : > { %3307 = vadd.xlane.f32.xlu0 %v3306_v4  ;;  %4808 = vmatprep.subr.mxu0 %v3542_v40 }
 0x950   : > { %v3315_v39 = vsel %vm1859_vm1, %v3303_v58, 0.0  ;;  %v3302_v10 = vadd.f32 %v5094_v60, %v3292_v3  ;;  %4809 = vmatpush3.msra.mxu0 %v3542_v40  ;;  %v3539_v60 = vld [vmem:[%s5349_s28 + $0x60] sm:$0xff] }
 0x951   : > { %3316 = vadd.xlane.f32.xlu1 %v3315_v39  ;;  %v3540_v39 = vld [vmem:[%s5349_s28 + $0x68] sm:$0xff] }
 0x952   : > { %v3312_v63 = vsel %vm1859_vm1, %v3302_v10, 0.0 }
 0x953   : > { %3313 = vadd.xlane.f32.xlu0 %v3312_v63  ;;  %v3537_v63 = vld [vmem:[%s5349_s28 + $0x50] sm:$0xff] }
 0x9d6   : > { %v3311_v11 = vpop.xlane.xlu1 %3310 }
 0x9d7   : > { %v3320_v49 = vmul.f32 0.015625, %v3311_v11  ;;  %v3536_v11 = vld [vmem:[%s5349_s28 + $0x48] sm:$0xff] }
 0x9d8   : > { %v3308_v7 = vpop.xlane.xlu0 %3307 }
 0x9d9   : > { %v3324_v6 = vsub.f32 %v3301_v47, %v3320_v49  ;;  %v3319_v1 = vmul.f32 0.015625, %v3308_v7  ;;  %v3535_v49 = vld [vmem:[%s5349_s28 + $0x40] sm:$0xff]  ;;  %v3534_v7 = vld [vmem:[%s5349_s28 + $0x38] sm:$0xff] }
 0x9da   : > { %v3317_v12 = vpop.xlane.xlu1 %3316 }
 0x9db   : > { %v3323_v46 = vsub.f32 %v3300_v43, %v3319_v1  ;;  %v3322_v14 = vmul.f32 0.015625, %v3317_v12  ;;  %v3328_v36 = vmul.f32 %v3324_v6, %v3324_v6  ;;  %v3532_v1 = vld [vmem:[%s5349_s28 + $0x28] sm:$0xff]  ;;  %v3531_v12 = vld [vmem:[%s5349_s28 + $0x20] sm:$0xff] }
 0x9dc   : > { %v3314_v17 = vpop.xlane.xlu0 %3313 }
 0x9dd   : > { %v5811_v9 = vsub.f32 %v3303_v58, %v3322_v14  ;;  %v3321_v24 = vmul.f32 0.015625, %v3314_v17  ;;  %v3334_v20 = vsel %vm1859_vm1, %v3328_v36, 0.0  ;;  %v3327_v15 = vmul.f32 %v3323_v46, %v3323_v46  ;;  %v3541_v58 = vld [vmem:[%s5349_s28 + $0x70] sm:$0xff]  ;;  %v3528_v36 = vld [vmem:[%s5349_s28 + $0x8] sm:$0xff]  ;;  %v3527_v17 = vld [vmem:[%s5349_s28] sm:$0xff] }
 0x9de   : > { %3335 = vadd.xlane.f32.xlu1 %v3334_v20  ;;  %4810 = vmatprep.subr.mxu0 %v3541_v58  ;;  %v3529_v14 = vld [vmem:[%s5349_s28 + $0x10] sm:$0xff] }
 0x9df   : > { %v3325_v62 = vsub.f32 %v3302_v10, %v3321_v24  ;;  %v3331_v26 = vsel %vm1859_vm1, %v3327_v15, 0.0  ;;  %v3330_v28 = vmul.f32 %v5811_v9, %v5811_v9  ;;  %4811 = vmatpush3.msra.mxu0 %v3541_v58  ;;  %v3538_v10 = vld [vmem:[%s5349_s28 + $0x58] sm:$0xff]  ;;  %v4336_v58 = vld [vmem:[%s1177_s27] ss:$0 sm:$0xff]  ;;  %s5980_s27 = sld [smem:[#allocation24_spill]] }
 0x9e0   : > { %3332 = vadd.xlane.f32.xlu0 %v3331_v26  ;;  %4812 = vmatprep.subr.mxu0 %v3540_v39 }
 0x9e1   : > { %v3340_v29 = vsel %vm1859_vm1, %v3330_v28, 0.0  ;;  %v3329_v13 = vmul.f32 %v3325_v62, %v3325_v62  ;;  %4813 = vmatpush3.msra.mxu0 %v3540_v39 }
 0x9e2   : > { %3341 = vadd.xlane.f32.xlu1 %v3340_v29  ;;  %4814 = vmatprep.subr.mxu0 %v3539_v60 }
 0x9e3   : > { %v3337_v30 = vsel %vm1859_vm1, %v3329_v13, 0.0  ;;  %4815 = vmatpush3.msra.mxu0 %v3539_v60 }
 0x9e4   : > { %3338 = vadd.xlane.f32.xlu0 %v3337_v30  ;;  %4816 = vmatprep.subr.mxu0 %v3538_v10 }
 0x9e5   : > { %4817 = vmatpush3.msra.mxu0 %v3538_v10  ;;  %p4339_p5 = scmp.ne.s32.totalorder %s5980_s27, 1 }
 0x9e6   : > { %4818 = vmatprep.subr.mxu0 %v3537_v63  ;;  %s5981_s22 = sld [smem:[#allocation14_spill]] (!%p4339_p5) }
 0x9e7   : > { %4819 = vmatpush3.msra.mxu0 %v3537_v63  ;;  %s5984_s15 = sld [smem:[#allocation16_spill]] (!%p4339_p5) }
 0x9e8   : > { %4820 = vmatprep.subr.mxu0 %v3536_v11  ;;  %s5985_s16 = sld [smem:[#allocation15_spill]] (!%p4339_p5) }
 0x9e9   : > { %4821 = vmatpush3.msra.mxu0 %v3536_v11  ;;  %s5986_s18 = sld [smem:[#allocation17_spill]] (!%p4339_p5) }
 0x9ea   : > { %4822 = vmatprep.subr.mxu0 %v3535_v49  ;;  %s5987_s1 = sld [smem:[#allocation22_spill]] (!%p4339_p5) }
 0x9eb   : > { %4823 = vmatpush3.msra.mxu0 %v3535_v49 }
 0x9ec   : > { %4824 = vmatprep.subr.mxu0 %v3534_v7 }
 0x9ed   : > { %4825 = vmatpush3.msra.mxu0 %v3534_v7 }
 0xa67   : > { %v3336_v5 = vpop.xlane.xlu1 %3335 }
 0xa68   : > { %v3344_v8 = vmul.f32 0.015625, %v3336_v5 }
 0xa69   : > { %v3333_v25 = vpop.xlane.xlu0 %3332 }
 0xa6a   : > { %v3348_v59 = vadd.f32 1e-12, %v3344_v8  ;;  %v3343_v33 = vmul.f32 0.015625, %v3333_v25 }
 0xa6b   : > { %v3342_v35 = vpop.xlane.xlu1 %3341 }
 0xa6c   : > { %5067 = vrsqrt.f32 %v3348_v59  ;;  %v3347_v37 = vadd.f32 1e-12, %v3343_v33  ;;  %v3346_v38 = vmul.f32 0.015625, %v3342_v35 }
 0xa6d   : > { %v3339_v41 = vpop.xlane.xlu0 %3338 }
 0xa6e   : > { %5069 = vrsqrt.f32 %v3347_v37  ;;  %v3350_v0 = vadd.f32 1e-12, %v3346_v38  ;;  %v3345_v42 = vmul.f32 0.015625, %v3339_v41 }
 0xa70   : > { %5071 = vrsqrt.f32 %v3350_v0  ;;  %v3349_v44 = vadd.f32 1e-12, %v3345_v42 }
 0xa72   : > { %5073 = vrsqrt.f32 %v3349_v44 }
 0xa79   : > { %v5068_v48 = vpop.eup %5067 }
 0xa7a   : > { %v3356_v50 = vmul.f32 %v5068_v48, %v3324_v6  ;;  %v3533_v6 = vld [vmem:[%s5349_s28 + $0x30] sm:$0xff] }
 0xa7b   : > { %v5070_v55 = vpop.eup %5069  ;;  %4826 = vmatprep.subr.mxu0 %v3533_v6 }
 0xa7c   : > { %v3355_v56 = vmul.f32 %v5070_v55, %v3323_v46  ;;  %v3366_v57 = vmul.f32 %v4329_v51, %v3356_v50  ;;  %4827 = vmatpush3.msra.mxu0 %v3533_v6  ;;  %v3530_v46 = vld [vmem:[%s5349_s28 + $0x18] sm:$0xff]  ;;  %s5983_s28 = sld [smem:[#allocation13_spill]] (!%p4339_p5) }
 0xa7d   : > { %v5072_v23 = vpop.eup %5071  ;;  %4828 = vmatprep.subr.mxu0 %v3532_v1 }
 0xa7e   : > { %v3365_v52 = vmul.f32 %v4329_v51, %v3355_v56  ;;  %v3358_v47 = vmul.f32 %v5072_v23, %v5811_v9  ;;  %v5836_v2 = vadd.f32 %v4330_v21, %v3366_v57  ;;  %4829 = vmatpush3.msra.mxu0 %v3532_v1  ;;  %v4331_v9 = vld [vmem:[%s1169_s21] ss:$0 sm:$0xff]  ;;  %s5979_s21 = scalar_lea.vmem %s5296_s5, %s5315_s0  ;;  %s5982_s0 = smov (!%p4339_p5), %s5981_s22 }
 0xa7f   : > { %v5074_v61 = vpop.eup %5073  ;;  %4830 = vmatprep.subr.mxu0 %v3531_v12 }
 0xa80   : > { %v5834_v54 = vadd.f32 %v4330_v21, %v3365_v52  ;;  %v3357_v53 = vmul.f32 %v5074_v61, %v3325_v62  ;;  %v3368_v43 = vmul.f32 %v4329_v51, %v3358_v47  ;;  %4831 = vmatpush3.msra.mxu0 %v3531_v12 }
 0xa81   : > { %4832 = vmatprep.subr.mxu0 %v3530_v46 }
 0xa82   : > { %4802 = vmatprep.mubr.msk.f32.mxu1 %vm1859_vm1, %v5834_v54  ;;  %v3367_v27 = vmul.f32 %v4329_v51, %v3357_v53  ;;  %v5844_v4 = vadd.f32 %v4330_v21, %v3368_v43  ;;  %4833 = vmatpush3.msra.mxu0 %v3530_v46 }
 0xa83   : > { %4803 = vmatmul.mubr.msk.f32.vlgmr.msra.gmra.mxu1 %vm1859_vm1, %v5836_v2  ;;  %4834 = vmatprep.subr.mxu0 %v3529_v14 }
 0xa84   : > { %v5842_v3 = vadd.f32 %v4330_v21, %v3367_v27  ;;  %4835 = vmatpush3.msra.mxu0 %v3529_v14 }
 0xa85   : > { %4836 = vmatprep.subr.mxu0 %v3528_v36 }
 0xa86   : > { %4805 = vmatprep.mubr.msk.f32.mxu1 %vm1859_vm1, %v5842_v3  ;;  %4837 = vmatpush3.msra.mxu0 %v3528_v36 }
 0xa87   : > { %4806 = vmatmul.mubr.msk.f32.gmra.mxu1 %vm1859_vm1, %v5844_v4  ;;  %4838 = vmatprep.subr.mxu0 %v3527_v17 }
 0xa88   : > { %4839 = vmatpush3.msra.mxu0 %v3527_v17 }
 0xb43   : > { %v4804_v24 = vpop.f32.mrf.mxu1 }
 0xb44   : > { %v3478_v20 = vadd.f32 %v4804_v24, %v4331_v9 }
 0xb45   : > { %v3472_v15 = vpop.f32.mrf.mxu1 }
 0xb46   : > { %v3496_v62 = vmul.f32 0.044715, %v3478_v20  ;;  %v3473_v26 = vadd.f32 %v4331_v9, %v3472_v15  ;;  %v3492_v23 = vmul.f32 0.5, %v3478_v20 }
 0xb47   : > { %v4807_v28 = vpop.f32.mrf.mxu1 }
 0xb48   : > { %v3500_v29 = vmul.f32 %v3496_v62, %v3478_v20  ;;  %v3495_v13 = vmul.f32 0.044715, %v3473_v26  ;;  %v3488_v30 = vadd.f32 %v4807_v28, %v4331_v9  ;;  %v3491_v51 = vmul.f32 0.5, %v3473_v26 }
 0xb49   : > { %v3482_v19 = vpop.f32.mrf.mxu1 }
 0xb4a   : > { %v3504_v16 = vmul.f32 %v3500_v29, %v3478_v20  ;;  %v3499_v31 = vmul.f32 %v3495_v13, %v3473_v26  ;;  %v3498_v34 = vmul.f32 0.044715, %v3488_v30  ;;  %v3483_v22 = vadd.f32 %v4331_v9, %v3482_v19 }
 0xb4b   : > { %v3494_v43 = vmul.f32 0.5, %v3488_v30 }
 0xb4c   : > { %v3508_v32 = vadd.f32 %v3504_v16, %v3478_v20  ;;  %v3502_v18 = vmul.f32 %v3498_v34, %v3488_v30  ;;  %v3497_v45 = vmul.f32 0.044715, %v3483_v22  ;;  %v3503_v5 = vmul.f32 %v3499_v31, %v3473_v26 }
 0xb4d   : > { %v3493_v61 = vmul.f32 0.5, %v3483_v22 }
 0xb4e   : > { %v3512_v8 = vmul.f32 0.7978846, %v3508_v32  ;;  %v3501_v25 = vmul.f32 %v3497_v45, %v3483_v22  ;;  %v3507_v59 = vadd.f32 %v3503_v5, %v3473_v26  ;;  %v3506_v33 = vmul.f32 %v3502_v18, %v3488_v30 }
 0xb50   : > { %5075 = vtanh.f32 %v3512_v8  ;;  %v3511_v35 = vmul.f32 0.7978846, %v3507_v59  ;;  %v3505_v37 = vmul.f32 %v3501_v25, %v3483_v22  ;;  %v3510_v38 = vadd.f32 %v3506_v33, %v3488_v30 }
 0xb52   : > { %5077 = vtanh.f32 %v3511_v35  ;;  %v3509_v41 = vadd.f32 %v3505_v37, %v3483_v22  ;;  %v3514_v0 = vmul.f32 0.7978846, %v3510_v38 }
 0xb54   : > { %v3513_v42 = vmul.f32 0.7978846, %v3509_v41  ;;  %5079 = vtanh.f32 %v3514_v0 }
 0xb56   : > { %5081 = vtanh.f32 %v3513_v42 }
 0xb5d   : > { %v5076_v44 = vpop.eup %5075 }
 0xb5e   : > { %v3520_v50 = vadd.f32 1.0, %v5076_v44 }
 0xb5f   : > { %v5078_v48 = vpop.eup %5077 }
 0xb60   : > { %v3519_v55 = vadd.f32 1.0, %v5078_v48  ;;  %v3524_v52 = vmul.f32 %v3520_v50, %v3492_v23  ;;  %v4337_v50 = vld [vmem:[%s5978_s17] ss:$0 sm:$0xff] }
 0xb61   : > { %v5080_v56 = vpop.eup %5079 }
 0xb62   : > { %v3523_v57 = vmul.f32 %v3519_v55, %v3491_v51  ;;  %v3522_v47 = vadd.f32 1.0, %v5080_v56  ;;  %v4338_v56 = vld [vmem:[%s5979_s21] ss:$0 sm:$0xff] }
 0xb63   : > { %v5082_v21 = vpop.eup %5081 }
 0xb64   : > { %4840 = vmatprep.mubr.f32.mxu0 %v3523_v57  ;;  %v3521_v53 = vadd.f32 1.0, %v5082_v21  ;;  %v3526_v40 = vmul.f32 %v3522_v47, %v3494_v43 }
 0xb65   : > { %4841 = vmatmul.mubr.f32.vlgmr.msra.gmra.mxu0 %v3524_v52 }
 0xb66   : > { %v3525_v27 = vmul.f32 %v3521_v53, %v3493_v61 }
 0xb68   : > { %4843 = vmatprep.mubr.f32.mxu0 %v3525_v27 }
 0xb69   : > { %4844 = vmatmul.mubr.f32.gmra.mxu0 %v3526_v40 }
 0xc25   : > { %v4842_v39 = vpop.f32.mrf.mxu0 }
 0xc26   : > { %v3622_v60 = vadd.f32 %v4842_v39, %v4336_v58 }
 0xc27   : > { %v3616_v10 = vpop.f32.mrf.mxu0 }
 0xc28   : > { %v3617_v63 = vadd.f32 %v4336_v58, %v3616_v10  ;;  %v3636_v11 = vadd.f32 %v3622_v60, %v5836_v2 }
 0xc29   : > { %v4845_v49 = vpop.f32.mrf.mxu0 }
 0xc2a   : > { %v3632_v7 = vadd.f32 %v4845_v49, %v4336_v58  ;;  %v3644_v6 = vsel %vm1859_vm1, %v3636_v11, 0.0  ;;  %v3635_v1 = vadd.f32 %v3617_v63, %v5834_v54 }
 0xc2b   : > { %3645 = vadd.xlane.f32.xlu1 %v3644_v6  ;;  %v3626_v12 = vpop.f32.mrf.mxu0 }
 0xc2c   : > { %v3627_v46 = vadd.f32 %v4336_v58, %v3626_v12  ;;  %v3641_v14 = vsel %vm1859_vm1, %v3635_v1, 0.0  ;;  %v3638_v36 = vadd.f32 %v3632_v7, %v5844_v4 }
 0xc2d   : > { %3642 = vadd.xlane.f32.xlu0 %v3641_v14 }
 0xc2e   : > { %v3650_v17 = vsel %vm1859_vm1, %v3638_v36, 0.0  ;;  %v3637_v9 = vadd.f32 %v3627_v46, %v5842_v3 }
 0xc2f   : > { %3651 = vadd.xlane.f32.xlu1 %v3650_v17 }
 0xc30   : > { %v3647_v2 = vsel %vm1859_vm1, %v3637_v9, 0.0 }
 0xc31   : > { %3648 = vadd.xlane.f32.xlu0 %v3647_v2 }
 0xcb4   : > { %v3646_v24 = vpop.xlane.xlu1 %3645 }
 0xcb5   : > { %v3654_v20 = vmul.f32 0.015625, %v3646_v24 }
 0xcb6   : > { %v3643_v15 = vpop.xlane.xlu0 %3642 }
 0xcb7   : > { %v3658_v54 = vsub.f32 %v3636_v11, %v3654_v20  ;;  %v3653_v62 = vmul.f32 0.015625, %v3643_v15 }
 0xcb8   : > { %v3652_v26 = vpop.xlane.xlu1 %3651 }
 0xcb9   : > { %v3657_v28 = vsub.f32 %v3635_v1, %v3653_v62  ;;  %v3656_v29 = vmul.f32 0.015625, %v3652_v26  ;;  %v3662_v13 = vmul.f32 %v3658_v54, %v3658_v54 }
 0xcba   : > { %v3649_v30 = vpop.xlane.xlu0 %3648 }
 0xcbb   : > { %v3660_v4 = vsub.f32 %v3638_v36, %v3656_v29  ;;  %v3655_v19 = vmul.f32 0.015625, %v3649_v30  ;;  %v3668_v16 = vsel %vm1859_vm1, %v3662_v13, 0.0  ;;  %v3661_v31 = vmul.f32 %v3657_v28, %v3657_v28 }
 0xcbc   : > { %3669 = vadd.xlane.f32.xlu1 %v3668_v16 }
 0xcbd   : > { %v3659_v3 = vsub.f32 %v3637_v9, %v3655_v19  ;;  %v3665_v34 = vsel %vm1859_vm1, %v3661_v31, 0.0  ;;  %v3664_v22 = vmul.f32 %v3660_v4, %v3660_v4 }
 0xcbe   : > { %3666 = vadd.xlane.f32.xlu0 %v3665_v34 }
 0xcbf   : > { %v3674_v32 = vsel %vm1859_vm1, %v3664_v22, 0.0  ;;  %v3663_v18 = vmul.f32 %v3659_v3, %v3659_v3 }
 0xcc0   : > { %3675 = vadd.xlane.f32.xlu1 %v3674_v32 }
 0xcc1   : > { %v3671_v45 = vsel %vm1859_vm1, %v3663_v18, 0.0 }
 0xcc2   : > { %3672 = vadd.xlane.f32.xlu0 %v3671_v45 }
 0xd45   : > { %v3670_v5 = vpop.xlane.xlu1 %3669 }
 0xd46   : > { %v3678_v8 = vmul.f32 0.015625, %v3670_v5 }
 0xd47   : > { %v3667_v25 = vpop.xlane.xlu0 %3666 }
 0xd48   : > { %v3682_v59 = vadd.f32 1e-12, %v3678_v8  ;;  %v3677_v33 = vmul.f32 0.015625, %v3667_v25 }
 0xd49   : > { %v3676_v35 = vpop.xlane.xlu1 %3675 }
 0xd4a   : > { %5083 = vrsqrt.f32 %v3682_v59  ;;  %v3681_v37 = vadd.f32 1e-12, %v3677_v33  ;;  %v3680_v38 = vmul.f32 0.015625, %v3676_v35 }
 0xd4b   : > { %v3673_v41 = vpop.xlane.xlu0 %3672 }
 0xd4c   : > { %5085 = vrsqrt.f32 %v3681_v37  ;;  %v3684_v0 = vadd.f32 1e-12, %v3680_v38  ;;  %v3679_v42 = vmul.f32 0.015625, %v3673_v41 }
 0xd4e   : > { %5087 = vrsqrt.f32 %v3684_v0  ;;  %v3683_v44 = vadd.f32 1e-12, %v3679_v42 }
 0xd50   : > { %5089 = vrsqrt.f32 %v3683_v44 }
 0xd57   : > { %v5084_v48 = vpop.eup %5083 }
 0xd58   : > { %v3690_v51 = vmul.f32 %v5084_v48, %v3658_v54 }
 0xd59   : > { %v5086_v55 = vpop.eup %5085 }
 0xd5a   : > { %v3700_v23 = vmul.f32 %v4337_v50, %v3690_v51  ;;  %v3689_v57 = vmul.f32 %v5086_v55, %v3657_v28 }
 0xd5b   : > { %v5088_v21 = vpop.eup %5087 }
 0xd5c   : > { %v3710_v52 = vadd.f32 %v4338_v56, %v3700_v23  ;;  %v3699_v47 = vmul.f32 %v4337_v50, %v3689_v57  ;;  %v3692_v61 = vmul.f32 %v5088_v21, %v3660_v4 }
 0xd5d   : > { %v5090_v53 = vpop.eup %5089 }
 0xd5e   : > { %3714 = vst.msk [vmem:[#allocation2 + $0x8] sm:$0xff] %vm1859_vm1, %v3710_v52  ;;  %v3709_v43 = vadd.f32 %v4338_v56, %v3699_v47  ;;  %v3702_v27 = vmul.f32 %v4337_v50, %v3692_v61  ;;  %v3691_v40 = vmul.f32 %v5090_v53, %v3659_v3 }
 0xd60   : > { %3713 = vst.msk [vmem:[#allocation2] sm:$0xff] %vm1859_vm1, %v3709_v43  ;;  %v3712_v58 = vadd.f32 %v4338_v56, %v3702_v27  ;;  %v3701_v39 = vmul.f32 %v4337_v50, %v3691_v40  ;;  %3720 = sbr.rel (%p4339_p5) target bundleno = 4022 (0xfb6), region = 152 }
 0xd62   : > { %3716 = vst.msk [vmem:[#allocation2 + $0x18] sm:$0xff] %vm1859_vm1, %v3712_v58  ;;  %v3711_v60 = vadd.f32 %v4338_v56, %v3701_v39 }
 0xd64   : > { %3715 = vst.msk [vmem:[#allocation2 + $0x10] sm:$0xff] %vm1859_vm1, %v3711_v60 }
 0xd65   : > { %v3802_v10 = vld [vmem:[%s5981_s22 + $0x38] sm:$0xff]  ;;  %v5136_v63 = vmov 0.0   ;;  %vm5137_vm13 = vmmov 0   ;;  %v3801_v11 = vld [vmem:[%s5982_s0 + $0x30] sm:$0xff]  ;;  %v3800_v49 = vld [vmem:[%s5982_s0 + $0x28] sm:$0xff] }
 0xd66   : > { %4846 = vmatprep.subr.mxu0 %v5136_v63  ;;  %4854 = vmatprep.mubr.msk.f32.mxu0 %vm5137_vm13, %v5136_v63  ;;  %v3721_v7 = vld [vmem:[%s5983_s28] sm:$0x3]  ;;  %v3798_v1 = vld [vmem:[%s5982_s0 + $0x18] sm:$0xff]  ;;  %v3797_v12 = vld [vmem:[%s5982_s0 + $0x10] sm:$0xff] }
 0xd67   : > { %4847 = vmatpush3.msra.mxu0 %v3712_v58  ;;  %4857 = vmatprep.subr.mxu1 %v5136_v63  ;;  %v3799_v6 = vld [vmem:[%s5982_s0 + $0x20] sm:$0xff]  ;;  %v3796_v46 = vld [vmem:[%s5982_s0 + $0x8] sm:$0xff]  ;;  %v3890_v36 = vld [vmem:[%s5984_s15 + $0x38] sm:$0xff] }
 0xd68   : > { %4848 = vmatprep.subr.mxu0 %v5136_v63  ;;  %4858 = vmatpush3.msra.mxu1 %v3802_v10  ;;  %v3795_v14 = vld [vmem:[%s5982_s0] sm:$0xff]  ;;  %v3889_v17 = vld [vmem:[%s5984_s15 + $0x30] sm:$0xff]  ;;  %v3888_v9 = vld [vmem:[%s5984_s15 + $0x28] sm:$0xff] }
 0xd69   : > { %4849 = vmatpush3.msra.mxu0 %v3711_v60  ;;  %4859 = vmatprep.subr.mxu1 %v5136_v63  ;;  %v3887_v2 = vld [vmem:[%s5984_s15 + $0x20] sm:$0xff]  ;;  %v3886_v24 = vld [vmem:[%s5984_s15 + $0x18] sm:$0xff]  ;;  %v3885_v20 = vld [vmem:[%s5984_s15 + $0x10] sm:$0xff] }
 0xd6a   : > { %4850 = vmatprep.subr.mxu0 %v5136_v63  ;;  %4860 = vmatpush3.msra.mxu1 %v3801_v11  ;;  %v3884_v62 = vld [vmem:[%s5984_s15 + $0x8] sm:$0xff]  ;;  %v3883_v26 = vld [vmem:[%s5984_s15] sm:$0xff] }
 0xd6b   : > { %4851 = vmatpush3.msra.mxu0 %v3710_v52  ;;  %4861 = vmatprep.subr.mxu1 %v5136_v63  ;;  %v4341_v28 = vld [vmem:[%s5985_s16] ss:$0 sm:$0xff] }
 0xd6c   : > { %4852 = vmatprep.subr.mxu0 %v5136_v63  ;;  %4862 = vmatpush3.msra.mxu1 %v3800_v49  ;;  %v4343_v4 = vld [vmem:[%s5986_s18] ss:$0 sm:$0xff] }
 0xd6d   : > { %4853 = vmatpush3.msra.mxu0 %v3709_v43  ;;  %4863 = vmatprep.subr.mxu1 %v5136_v63 }
 0xd6e   : > { %4855 = vmatmul.mubr.msk.f32.vlgmr.msra.gmra.mxu0 %vm2281_vm12, %v3721_v7  ;;  %4864 = vmatpush3.msra.mxu1 %v3799_v6 }
 0xd6f   : > { %4865 = vmatprep.subr.mxu1 %v5136_v63  ;;  %4873 = vmatprep.mubr.msk.f32.mxu1 %vm5137_vm13, %v5136_v63 }
 0xd70   : > { %4866 = vmatpush3.msra.mxu1 %v3798_v1  ;;  %4876 = vmatprep.subr.mxu0 %v5136_v63 }
 0xd71   : > { %4867 = vmatprep.subr.mxu1 %v5136_v63  ;;  %4892 = vmatprep.mubr.msk.f32.mxu0 %vm5137_vm13, %v5136_v63 }
 0xd72   : > { %4868 = vmatpush3.msra.mxu1 %v3797_v12  ;;  %4877 = vmatpush3.msra.mxu0 %v3890_v36 }
 0xd73   : > { %4869 = vmatprep.subr.mxu1 %v5136_v63  ;;  %4878 = vmatprep.subr.mxu0 %v5136_v63 }
 0xd74   : > { %4870 = vmatpush3.msra.mxu1 %v3796_v46  ;;  %4879 = vmatpush3.msra.mxu0 %v3889_v17 }
 0xd75   : > { %4871 = vmatprep.subr.mxu1 %v5136_v63  ;;  %4880 = vmatprep.subr.mxu0 %v5136_v63 }
 0xd76   : > { %4872 = vmatpush3.msra.mxu1 %v3795_v14  ;;  %4881 = vmatpush3.msra.mxu0 %v3888_v9 }
 0xd77   : > { %4882 = vmatprep.subr.mxu0 %v5136_v63 }
 0xd78   : > { %4883 = vmatpush3.msra.mxu0 %v3887_v2 }
 0xd79   : > { %4884 = vmatprep.subr.mxu0 %v5136_v63 }
 0xd7a   : > { %4885 = vmatpush3.msra.mxu0 %v3886_v24 }
 0xd7b   : > { %4886 = vmatprep.subr.mxu0 %v5136_v63 }
 0xd7c   : > { %4887 = vmatpush3.msra.mxu0 %v3885_v20 }
 0xd7d   : > { %4888 = vmatprep.subr.mxu0 %v5136_v63 }
 0xd7e   : > { %4889 = vmatpush3.msra.mxu0 %v3884_v62 }
 0xd7f   : > { %4890 = vmatprep.subr.mxu0 %v5136_v63 }
 0xd80   : > { %4891 = vmatpush3.msra.mxu0 %v3883_v26 }
 0xe2e   : > { %v3791_v15 = vpop.f32.mrf.mxu0 }
 0xe2f   : > { %4874 = vmatmul.mubr.msk.f32.vlgmr.msra.gmra.mxu1 %vm1859_vm1, %v3791_v15 }
 0xe30   : > { %v4856_v54 = vpop.f32.mrf.mxu0 }
 0xeef   : > { %v3879_v29 = vpop.f32.mrf.mxu1 }
 0xef0   : > { %v3880_v13 = vadd.f32 %v4341_v28, %v3879_v29 }
 0xef1   : > { %v4875_v30 = vpop.f32.mrf.mxu1 }
 0xef2   : > { %4893 = vmatmul.mubr.msk.f32.vlgmr.msra.gmra.mxu0 %vm1859_vm1, %v3880_v13 }
 0xfb2   : > { %v3967_v19 = vpop.f32.mrf.mxu0 }
 0xfb3   : > { %v3968_v16 = vadd.f32 %v4343_v4, %v3967_v19 }
 0xfb4   : > { %v4894_v31 = vpop.f32.mrf.mxu0 }
 0xfb5   : > { %3971 = vst [vmem:[%s5987_s1] sm:$0x3] %v3968_v16 }
 0xfb6 PF: > { %s5988_s23 = sld [smem:[#allocation23_spill]] }
 0xfbc   : > { %s73_s22 = sadd.s32 1, %s5988_s23  }
 0xfbd   : > { %p70_p6 = scmp.ge.s32.totalorder %s73_s22, 4  }
 0xfbf   :  { %72 = sbr.rel (!%p70_p6) target bundleno = 58 (0x3a), region = 254 }

</bundles_post_ra>
